<compile_context>
chip_gen: v7x
topology: tpu7x:2x2x1
jax: 0.10.0
libtpu: 0.0.40
codegen_flags: <defaults>
</compile_context>

<pallas_src>
import functools

import jax
import jax.numpy as jnp
from jax import lax
from jax.experimental import pallas as pl
from jax.experimental.pallas import tpu as pltpu

# ----------------------------- config (small, synthetic) --------------------
NUM_SENTS = 8     # N : number of sentences in attn_mem
INPUT_DIM = 32    # D : LSTM input size == attn_mem feature dim
N_HIDDEN  = 32    # H : LSTM hidden size
N_HOP     = 2     # hop-attention iterations
N_STEP    = 4     # number of decoding steps (scores returned)

VEC_ROWS  = 8     # rows in the packed vector slab


# ----------------------------- Pallas kernel --------------------------------
def _ptr_scorer_kernel(n_step, n_hop, n_hidden, input_dim,
                       mem_ref, w_lstm_ref, w_attn_ref, vec_ref, out_ref):
    D, H = input_dim, n_hidden

    mem = mem_ref[...]                                   # [N, D]

    # -- unpack slabs (static slices on VMEM refs are free) -------------------
    w_ih    = w_lstm_ref[0:D, :]                         # [D, 4H]
    w_hh    = w_lstm_ref[D:D + H, :]                     # [H, 4H]
    wm      = w_attn_ref[0:D, :]                         # [D, 2H] = [attn_wm | hop_wm]
    attn_wq = w_attn_ref[D:D + H, 0:H]                   # [H, H]
    hop_wq  = w_attn_ref[D:D + H, H:2 * H]               # [H, H]

    bias    = vec_ref[0:1, 0:4 * H]                      # [1, 4H]
    h0      = vec_ref[1:2, 0:H]                          # [1, H]
    c0      = vec_ref[2:3, 0:H]                          # [1, H]
    init_i  = vec_ref[3:4, 0:D]                          # [1, D]
    attn_v  = vec_ref[4:5, 0:H]                          # [1, H] (row form)
    hop_v   = vec_ref[5:6, 0:H]                          # [1, H] (row form)
    w_score = vec_ref[6:7, 0:D]                          # [1, D] (row form)
    b_score = vec_ref[7:8, 0:1]                          # [1, 1]

    # -- fused feature projection: one MXU dot instead of two -----------------
    feats = jnp.dot(mem, wm, preferred_element_type=jnp.float32)   # [N, 2H]
    attn_feat = feats[:, 0:H]                                      # [N, H]
    hop_feat  = feats[:, H:2 * H]                                  # [N, H]

    # -- loop-invariant LSTM term (h0/c0 are never updated: reference quirk) --
    hh_bias = jnp.dot(h0, w_hh, preferred_element_type=jnp.float32) + bias  # [1, 4H]

    def attention(att, att_feat, query, v_row, w):
        # sum_ = attention_feat + query @ w ; logits = tanh(sum_) @ v
        # sentence axis stays on sublanes: logits is [N, 1], softmax over axis 0,
        # context = sum over sublanes of probs * att  (no transpose, no MXU dot).
        s = att_feat + jnp.dot(query, w, preferred_element_type=jnp.float32)  # [N, H]
        logits = jnp.sum(jnp.tanh(s) * v_row, axis=-1, keepdims=True)         # [N, 1]
        m = jnp.max(logits, axis=0, keepdims=True)
        e = jnp.exp(logits - m)
        inv = pl.reciprocal(jnp.sum(e, axis=0, keepdims=True), approx=True)
        probs = e * inv                                                       # [N, 1]
        return jnp.sum(probs * att, axis=0, keepdims=True)                    # [1, cols(att)]

    scores_vec = jnp.zeros((1, n_step), jnp.float32)
    lane_idx = lax.broadcasted_iota(jnp.int32, (1, n_step), 1)

    lstm_in = init_i
    for t in range(n_step):                 # fully unrolled: n_step is static
        # single-layer LSTMCell; (h0, c0) intentionally NOT carried across steps
        gates = jnp.dot(lstm_in, w_ih, preferred_element_type=jnp.float32) + hh_bias  # [1, 4H]
        sig = jax.nn.sigmoid(gates)         # one full-vreg EUP pass
        th  = jnp.tanh(gates)               # one full-vreg EUP pass
        i_g = sig[:, 0:H]
        f_g = sig[:, H:2 * H]
        g_g = th[:, 2 * H:3 * H]
        o_g = sig[:, 3 * H:4 * H]
        c = f_g * c0 + i_g * g_g
        h = o_g * jnp.tanh(c)                                                 # [1, H]

        query = h                           # h[:, -1, :] with n_layer = 1
        for _ in range(n_hop):              # unrolled: n_hop is static
            query = attention(hop_feat, hop_feat, query, hop_v, hop_wq)       # [1, H]
        output = attention(mem, attn_feat, query, attn_v, attn_wq)            # [1, D]

        score = jnp.sum(output * w_score, axis=-1, keepdims=True) + b_score   # [1, 1]
        scores_vec = jnp.where(lane_idx == t, score, scores_vec)
        lstm_in = output

    out_ref[...] = scores_vec               # single lane-axis store


# ----------------------------- wrapper ---------------------------------------
def _pad_lanes(v, width):
    v = jnp.asarray(v, jnp.float32).reshape(1, -1)
    return jnp.pad(v, ((0, 0), (0, width - v.shape[1])))


def _pack_params(params, input_dim=INPUT_DIM, n_hidden=N_HIDDEN):
    D, H = input_dim, n_hidden
    # LSTM weight slab [D+H, 4H]
    w_lstm = jnp.concatenate([params["w_ih_t"], params["w_hh_t"]], axis=0)
    # attention weight slab [D+H, 2H]: rows 0:D = [attn_wm|hop_wm], rows D: = [attn_wq|hop_wq]
    w_attn = jnp.concatenate(
        [jnp.concatenate([params["attn_wm"], params["hop_wm"]], axis=1),
         jnp.concatenate([params["attn_wq"], params["hop_wq"]], axis=1)],
        axis=0)
    # vector slab [8, lanes]
    lanes = max(128, 4 * H)
    vec = jnp.concatenate([
        _pad_lanes(params["bias"], lanes),        # row 0
        _pad_lanes(params["init_h"], lanes),      # row 1
        _pad_lanes(params["init_c"], lanes),      # row 2
        _pad_lanes(params["init_i"], lanes),      # row 3
        _pad_lanes(params["attn_v"], lanes),      # row 4
        _pad_lanes(params["hop_v"], lanes),       # row 5
        _pad_lanes(params["w_score_t"], lanes),   # row 6
        _pad_lanes(params["b_score"], lanes),     # row 7
    ], axis=0)
    return w_lstm, w_attn, vec


@functools.partial(jax.jit, static_argnames=("n_step", "n_hop"))
def ptr_scorer_pallas(params, attn_mem, *, n_step=N_STEP, n_hop=N_HOP):
    """Returns scores stacked as [n_step, 1] (reference returns a list of [1,1])."""
    w_lstm, w_attn, vec = _pack_params(params)
    kernel = functools.partial(_ptr_scorer_kernel, n_step, n_hop, N_HIDDEN, INPUT_DIM)
    vmem = lambda: pl.BlockSpec(memory_space=pltpu.MemorySpace.VMEM)
    scores = pl.pallas_call(
        kernel,
        out_shape=jax.ShapeDtypeStruct((1, n_step), jnp.float32),  # lane-axis output
        in_specs=[vmem(), vmem(), vmem(), vmem()],
        out_specs=vmem(),
    )(attn_mem, w_lstm, w_attn, vec)
    return scores.reshape(n_step, 1)

# TODO(synk): if this scorer is ever called over a batch of documents/beams,
# add a leading "parallel" grid axis over the batch (2x on v7x's two cores).


# ----------------------------- pure-JAX reference ----------------------------
def ptr_scorer_reference(params, attn_mem, *, n_step=N_STEP, n_hop=N_HOP):
    H = N_HIDDEN
    attn_feat = attn_mem @ params["attn_wm"]
    hop_feat = attn_mem @ params["hop_wm"]
    h0, c0 = params["init_h"], params["init_c"]
    lstm_in = params["init_i"]

    def attention(att, att_feat, query, v, w):
        s = att_feat + query @ w
        probs = jax.nn.softmax((jnp.tanh(s) @ v).T, axis=-1)
        return probs @ att

    scores = []
    for _ in range(n_step):
        gates = lstm_in @ params["w_ih_t"] + h0 @ params["w_hh_t"] + params["bias"]
        i_g = jax.nn.sigmoid(gates[:, 0:H])
        f_g = jax.nn.sigmoid(gates[:, H:2 * H])
        g_g = jnp.tanh(gates[:, 2 * H:3 * H])
        o_g = jax.nn.sigmoid(gates[:, 3 * H:4 * H])
        c = f_g * c0 + i_g * g_g
        h = o_g * jnp.tanh(c)
        query = h
        for _ in range(n_hop):
            query = attention(hop_feat, hop_feat, query, params["hop_v"], params["hop_wq"])
        output = attention(attn_mem, attn_feat, query, params["attn_v"], params["attn_wq"])
        scores.append((output @ params["w_score_t"] + params["b_score"])[0])
        lstm_in = output
    return jnp.stack(scores)   # [n_step, 1]


# ----------------------------- deterministic params --------------------------
def init_params(key, input_dim=INPUT_DIM, n_hidden=N_HIDDEN):
    ks = jax.random.split(key, 15)
    s = 0.1
    nrm = lambda k, shp: (s * jax.random.normal(k, shp)).astype(jnp.float32)
    w_ih = nrm(ks[0], (4 * n_hidden, input_dim))     # torch LSTMCell weight_ih
    w_hh = nrm(ks[1], (4 * n_hidden, n_hidden))      # torch LSTMCell weight_hh
    b_ih = nrm(ks[2], (4 * n_hidden,))
    b_hh = nrm(ks[3], (4 * n_hidden,))
    w_score = nrm(ks[4], (1, input_dim))             # nn.Linear(input_dim, 1).weight
    b_score = nrm(ks[5], (1,))
    return {
        "attn_wm": nrm(ks[6], (input_dim, n_hidden)),
        "attn_wq": nrm(ks[7], (n_hidden, n_hidden)),
        "attn_v":  nrm(ks[8], (n_hidden, 1)),        # _attn_v stored as column
        "hop_wm":  nrm(ks[9], (input_dim, n_hidden)),
        "hop_wq":  nrm(ks[10], (n_hidden, n_hidden)),
        "hop_v":   nrm(ks[11], (n_hidden, 1)),
        "init_h":  nrm(ks[12], (1, n_hidden)),       # n_layer = 1
        "init_c":  nrm(ks[13], (1, n_hidden)),
        "init_i":  nrm(ks[14], (1, input_dim)),      # _init_i.unsqueeze(0)
        "w_ih_t":  w_ih.T,                           # [D, 4H]
        "w_hh_t":  w_hh.T,                           # [H, 4H]
        "bias":    (b_ih + b_hh)[None, :],           # [1, 4H]
        "w_score_t": w_score.T,                      # [D, 1]
        "b_score": b_score[None, :],                 # [1, 1]
    }


# ----------------------------- main ------------------------------------------
if __name__ == "__main__":
    key = jax.random.PRNGKey(0)
    k_param, k_mem = jax.random.split(key)
    params = init_params(k_param)
    attn_mem = jax.random.normal(k_mem, (NUM_SENTS, INPUT_DIM), jnp.float32)

    scores = ptr_scorer_pallas(params, attn_mem)
    scores = jax.block_until_ready(scores)

    ref = jax.block_until_ready(ptr_scorer_reference(params, attn_mem))
    if not jnp.allclose(scores, ref, atol=1e-2, rtol=1e-2):
        raise AssertionError(f"mismatch:\n{scores}\nvs\n{ref}")

    print("KERNEL_OK")
</pallas_src>

<mosaic_0001>
module attributes {stable_mosaic.version = 11 : i64} {
  func.func @_ptr_scorer_kernel(%arg0: memref<8x32xf32, #tpu.memory_space<vmem>>, %arg1: memref<64x128xf32, #tpu.memory_space<vmem>>, %arg2: memref<64x64xf32, #tpu.memory_space<vmem>>, %arg3: memref<8x128xf32, #tpu.memory_space<vmem>>, %arg4: memref<1x4xf32, #tpu.memory_space<vmem>>) attributes {dimension_semantics = [], scalar_prefetch = 0 : i64, scratch_operands = 0 : i64, tpu.core_type = #tpu.core_type<tc>} {
    %c0 = arith.constant 0 : index
    %c0_0 = arith.constant 0 : index
    %0 = vector.load %arg0[%c0, %c0_0] : memref<8x32xf32, #tpu.memory_space<vmem>>, vector<8x32xf32>
    %c0_1 = arith.constant 0 : index
    %c0_2 = arith.constant 0 : index
    %1 = vector.load %arg1[%c0_1, %c0_2] : memref<64x128xf32, #tpu.memory_space<vmem>>, vector<32x128xf32>
    %c32 = arith.constant 32 : index
    %c0_3 = arith.constant 0 : index
    %2 = vector.load %arg1[%c32, %c0_3] : memref<64x128xf32, #tpu.memory_space<vmem>>, vector<32x128xf32>
    %c0_4 = arith.constant 0 : index
    %c0_5 = arith.constant 0 : index
    %3 = vector.load %arg2[%c0_4, %c0_5] : memref<64x64xf32, #tpu.memory_space<vmem>>, vector<32x64xf32>
    %c32_6 = arith.constant 32 : index
    %c0_7 = arith.constant 0 : index
    %4 = vector.load %arg2[%c32_6, %c0_7] : memref<64x64xf32, #tpu.memory_space<vmem>>, vector<32x32xf32>
    %c32_8 = arith.constant 32 : index
    %c32_9 = arith.constant 32 : index
    %5 = vector.load %arg2[%c32_8, %c32_9] : memref<64x64xf32, #tpu.memory_space<vmem>>, vector<32x32xf32>
    %c0_10 = arith.constant 0 : index
    %c0_11 = arith.constant 0 : index
    %6 = vector.load %arg3[%c0_10, %c0_11] : memref<8x128xf32, #tpu.memory_space<vmem>>, vector<1x128xf32>
    %c1 = arith.constant 1 : index
    %c0_12 = arith.constant 0 : index
    %7 = vector.load %arg3[%c1, %c0_12] : memref<8x128xf32, #tpu.memory_space<vmem>>, vector<1x32xf32>
    %c2 = arith.constant 2 : index
    %c0_13 = arith.constant 0 : index
    %8 = vector.load %arg3[%c2, %c0_13] : memref<8x128xf32, #tpu.memory_space<vmem>>, vector<1x32xf32>
    %c3 = arith.constant 3 : index
    %c0_14 = arith.constant 0 : index
    %9 = vector.load %arg3[%c3, %c0_14] : memref<8x128xf32, #tpu.memory_space<vmem>>, vector<1x32xf32>
    %c4 = arith.constant 4 : index
    %c0_15 = arith.constant 0 : index
    %10 = vector.load %arg3[%c4, %c0_15] : memref<8x128xf32, #tpu.memory_space<vmem>>, vector<1x32xf32>
    %c5 = arith.constant 5 : index
    %c0_16 = arith.constant 0 : index
    %11 = vector.load %arg3[%c5, %c0_16] : memref<8x128xf32, #tpu.memory_space<vmem>>, vector<1x32xf32>
    %c6 = arith.constant 6 : index
    %c0_17 = arith.constant 0 : index
    %12 = vector.load %arg3[%c6, %c0_17] : memref<8x128xf32, #tpu.memory_space<vmem>>, vector<1x32xf32>
    %c7 = arith.constant 7 : index
    %c0_18 = arith.constant 0 : index
    %13 = vector.load %arg3[%c7, %c0_18] : memref<8x128xf32, #tpu.memory_space<vmem>>, vector<1x1xf32>
    %cst = arith.constant dense<0.000000e+00> : vector<8x64xf32>
    %14 = tpu.matmul %0, %3, %cst {dimension_numbers = #tpu.dot_dimension_numbers<[1], [0], [0], [1], [0, 0, 1, 1], [], []>} : vector<8x32xf32>, vector<32x64xf32>, vector<8x64xf32> -> vector<8x64xf32>
    %15 = vector.extract_strided_slice %14 {offsets = [0, 0], sizes = [8, 32], strides = [1, 1]} : vector<8x64xf32> to vector<8x32xf32>
    %16 = vector.extract_strided_slice %14 {offsets = [0, 32], sizes = [8, 32], strides = [1, 1]} : vector<8x64xf32> to vector<8x32xf32>
    %cst_19 = arith.constant dense<0.000000e+00> : vector<1x128xf32>
    %17 = tpu.matmul %7, %2, %cst_19 {dimension_numbers = #tpu.dot_dimension_numbers<[1], [0], [0], [1], [0, 0, 1, 1], [], []>} : vector<1x32xf32>, vector<32x128xf32>, vector<1x128xf32> -> vector<1x128xf32>
    %18 = arith.addf %17, %6 : vector<1x128xf32>
    %cst_20 = arith.constant 0.000000e+00 : f32
    %19 = vector.broadcast %cst_20 : f32 to vector<1x4xf32>
    %20 = tpu.iota {dimensions = array<i32: 1>} : vector<1x4xi32>
    %cst_21 = arith.constant dense<0.000000e+00> : vector<1x128xf32>
    %21 = tpu.matmul %9, %1, %cst_21 {dimension_numbers = #tpu.dot_dimension_numbers<[1], [0], [0], [1], [0, 0, 1, 1], [], []>} : vector<1x32xf32>, vector<32x128xf32>, vector<1x128xf32> -> vector<1x128xf32>
    %22 = arith.addf %21, %18 : vector<1x128xf32>
    %23 = arith.negf %22 : vector<1x128xf32>
    %24 = math.exp %23 : vector<1x128xf32>
    %cst_22 = arith.constant 1.000000e+00 : f32
    %25 = vector.broadcast %cst_22 : f32 to vector<1x128xf32>
    %26 = arith.addf %25, %24 : vector<1x128xf32>
    %27 = arith.divf %25, %26 : vector<1x128xf32>
    %28 = math.tanh %22 : vector<1x128xf32>
    %29 = vector.extract_strided_slice %27 {offsets = [0, 0], sizes = [1, 32], strides = [1, 1]} : vector<1x128xf32> to vector<1x32xf32>
    %30 = vector.extract_strided_slice %27 {offsets = [0, 32], sizes = [1, 32], strides = [1, 1]} : vector<1x128xf32> to vector<1x32xf32>
    %31 = vector.extract_strided_slice %28 {offsets = [0, 64], sizes = [1, 32], strides = [1, 1]} : vector<1x128xf32> to vector<1x32xf32>
    %32 = vector.extract_strided_slice %27 {offsets = [0, 96], sizes = [1, 32], strides = [1, 1]} : vector<1x128xf32> to vector<1x32xf32>
    %33 = arith.mulf %30, %8 : vector<1x32xf32>
    %34 = arith.mulf %29, %31 : vector<1x32xf32>
    %35 = arith.addf %33, %34 : vector<1x32xf32>
    %36 = math.tanh %35 : vector<1x32xf32>
    %37 = arith.mulf %32, %36 : vector<1x32xf32>
    %cst_23 = arith.constant dense<0.000000e+00> : vector<1x32xf32>
    %38 = tpu.matmul %37, %5, %cst_23 {dimension_numbers = #tpu.dot_dimension_numbers<[1], [0], [0], [1], [0, 0, 1, 1], [], []>} : vector<1x32xf32>, vector<32x32xf32>, vector<1x32xf32> -> vector<1x32xf32>
    %39 = vector.broadcast %38 : vector<1x32xf32> to vector<8x32xf32>
    %40 = arith.addf %16, %39 : vector<8x32xf32>
    %41 = math.tanh %40 : vector<8x32xf32>
    %42 = vector.broadcast %11 : vector<1x32xf32> to vector<8x32xf32>
    %43 = arith.mulf %41, %42 : vector<8x32xf32>
    %cst_24 = arith.constant dense<0.000000e+00> : vector<8xf32>
    %44 = vector.multi_reduction <add>, %43, %cst_24 [1] : vector<8x32xf32> to vector<8xf32>
    %45 = vector.shape_cast %44 : vector<8xf32> to vector<8x1xf32>
    %cst_25 = arith.constant dense<0xFF800000> : vector<1xf32>
    %46 = vector.multi_reduction <maximumf>, %45, %cst_25 [0] : vector<8x1xf32> to vector<1xf32>
    %47 = vector.shape_cast %46 : vector<1xf32> to vector<1x1xf32>
    %48 = vector.broadcast %47 : vector<1x1xf32> to vector<8x1xf32>
    %49 = arith.subf %45, %48 : vector<8x1xf32>
    %50 = math.exp %49 : vector<8x1xf32>
    %cst_26 = arith.constant dense<0.000000e+00> : vector<1xf32>
    %51 = vector.multi_reduction <add>, %50, %cst_26 [0] : vector<8x1xf32> to vector<1xf32>
    %52 = vector.shape_cast %51 : vector<1xf32> to vector<1x1xf32>
    %53 = tpu.reciprocal %52 {approx = true} : vector<1x1xf32> -> vector<1x1xf32>
    %54 = vector.broadcast %53 : vector<1x1xf32> to vector<8x1xf32>
    %55 = arith.mulf %50, %54 : vector<8x1xf32>
    %56 = vector.broadcast %55 : vector<8x1xf32> to vector<8x32xf32>
    %57 = arith.mulf %56, %16 : vector<8x32xf32>
    %cst_27 = arith.constant dense<0.000000e+00> : vector<32xf32>
    %58 = vector.multi_reduction <add>, %57, %cst_27 [0] : vector<8x32xf32> to vector<32xf32>
    %59 = vector.shape_cast %58 : vector<32xf32> to vector<1x32xf32>
    %cst_28 = arith.constant dense<0.000000e+00> : vector<1x32xf32>
    %60 = tpu.matmul %59, %5, %cst_28 {dimension_numbers = #tpu.dot_dimension_numbers<[1], [0], [0], [1], [0, 0, 1, 1], [], []>} : vector<1x32xf32>, vector<32x32xf32>, vector<1x32xf32> -> vector<1x32xf32>
    %61 = vector.broadcast %60 : vector<1x32xf32> to vector<8x32xf32>
    %62 = arith.addf %16, %61 : vector<8x32xf32>
    %63 = math.tanh %62 : vector<8x32xf32>
    %64 = vector.broadcast %11 : vector<1x32xf32> to vector<8x32xf32>
    %65 = arith.mulf %63, %64 : vector<8x32xf32>
    %cst_29 = arith.constant dense<0.000000e+00> : vector<8xf32>
    %66 = vector.multi_reduction <add>, %65, %cst_29 [1] : vector<8x32xf32> to vector<8xf32>
    %67 = vector.shape_cast %66 : vector<8xf32> to vector<8x1xf32>
    %cst_30 = arith.constant dense<0xFF800000> : vector<1xf32>
    %68 = vector.multi_reduction <maximumf>, %67, %cst_30 [0] : vector<8x1xf32> to vector<1xf32>
    %69 = vector.shape_cast %68 : vector<1xf32> to vector<1x1xf32>
    %70 = vector.broadcast %69 : vector<1x1xf32> to vector<8x1xf32>
    %71 = arith.subf %67, %70 : vector<8x1xf32>
    %72 = math.exp %71 : vector<8x1xf32>
    %cst_31 = arith.constant dense<0.000000e+00> : vector<1xf32>
    %73 = vector.multi_reduction <add>, %72, %cst_31 [0] : vector<8x1xf32> to vector<1xf32>
    %74 = vector.shape_cast %73 : vector<1xf32> to vector<1x1xf32>
    %75 = tpu.reciprocal %74 {approx = true} : vector<1x1xf32> -> vector<1x1xf32>
    %76 = vector.broadcast %75 : vector<1x1xf32> to vector<8x1xf32>
    %77 = arith.mulf %72, %76 : vector<8x1xf32>
    %78 = vector.broadcast %77 : vector<8x1xf32> to vector<8x32xf32>
    %79 = arith.mulf %78, %16 : vector<8x32xf32>
    %cst_32 = arith.constant dense<0.000000e+00> : vector<32xf32>
    %80 = vector.multi_reduction <add>, %79, %cst_32 [0] : vector<8x32xf32> to vector<32xf32>
    %81 = vector.shape_cast %80 : vector<32xf32> to vector<1x32xf32>
    %cst_33 = arith.constant dense<0.000000e+00> : vector<1x32xf32>
    %82 = tpu.matmul %81, %4, %cst_33 {dimension_numbers = #tpu.dot_dimension_numbers<[1], [0], [0], [1], [0, 0, 1, 1], [], []>} : vector<1x32xf32>, vector<32x32xf32>, vector<1x32xf32> -> vector<1x32xf32>
    %83 = vector.broadcast %82 : vector<1x32xf32> to vector<8x32xf32>
    %84 = arith.addf %15, %83 : vector<8x32xf32>
    %85 = math.tanh %84 : vector<8x32xf32>
    %86 = vector.broadcast %10 : vector<1x32xf32> to vector<8x32xf32>
    %87 = arith.mulf %85, %86 : vector<8x32xf32>
    %cst_34 = arith.constant dense<0.000000e+00> : vector<8xf32>
    %88 = vector.multi_reduction <add>, %87, %cst_34 [1] : vector<8x32xf32> to vector<8xf32>
    %89 = vector.shape_cast %88 : vector<8xf32> to vector<8x1xf32>
    %cst_35 = arith.constant dense<0xFF800000> : vector<1xf32>
    %90 = vector.multi_reduction <maximumf>, %89, %cst_35 [0] : vector<8x1xf32> to vector<1xf32>
    %91 = vector.shape_cast %90 : vector<1xf32> to vector<1x1xf32>
    %92 = vector.broadcast %91 : vector<1x1xf32> to vector<8x1xf32>
    %93 = arith.subf %89, %92 : vector<8x1xf32>
    %94 = math.exp %93 : vector<8x1xf32>
    %cst_36 = arith.constant dense<0.000000e+00> : vector<1xf32>
    %95 = vector.multi_reduction <add>, %94, %cst_36 [0] : vector<8x1xf32> to vector<1xf32>
    %96 = vector.shape_cast %95 : vector<1xf32> to vector<1x1xf32>
    %97 = tpu.reciprocal %96 {approx = true} : vector<1x1xf32> -> vector<1x1xf32>
    %98 = vector.broadcast %97 : vector<1x1xf32> to vector<8x1xf32>
    %99 = arith.mulf %94, %98 : vector<8x1xf32>
    %100 = vector.broadcast %99 : vector<8x1xf32> to vector<8x32xf32>
    %101 = arith.mulf %100, %0 : vector<8x32xf32>
    %cst_37 = arith.constant dense<0.000000e+00> : vector<32xf32>
    %102 = vector.multi_reduction <add>, %101, %cst_37 [0] : vector<8x32xf32> to vector<32xf32>
    %103 = vector.shape_cast %102 : vector<32xf32> to vector<1x32xf32>
    %104 = arith.mulf %103, %12 : vector<1x32xf32>
    %cst_38 = arith.constant dense<0.000000e+00> : vector<1xf32>
    %105 = vector.multi_reduction <add>, %104, %cst_38 [1] : vector<1x32xf32> to vector<1xf32>
    %106 = vector.shape_cast %105 : vector<1xf32> to vector<1x1xf32>
    %107 = arith.addf %106, %13 : vector<1x1xf32>
    %c0_i32 = arith.constant 0 : i32
    %108 = vector.broadcast %c0_i32 : i32 to vector<1x4xi32>
    %109 = arith.cmpi eq, %20, %108 : vector<1x4xi32>
    %110 = vector.shape_cast %107 : vector<1x1xf32> to vector<1x1xf32>
    %111 = vector.broadcast %110 : vector<1x1xf32> to vector<1x4xf32>
    %112 = arith.select %109, %111, %19 : vector<1x4xi1>, vector<1x4xf32>
    %cst_39 = arith.constant dense<0.000000e+00> : vector<1x128xf32>
    %113 = tpu.matmul %103, %1, %cst_39 {dimension_numbers = #tpu.dot_dimension_numbers<[1], [0], [0], [1], [0, 0, 1, 1], [], []>} : vector<1x32xf32>, vector<32x128xf32>, vector<1x128xf32> -> vector<1x128xf32>
    %114 = arith.addf %113, %18 : vector<1x128xf32>
    %115 = arith.negf %114 : vector<1x128xf32>
    %116 = math.exp %115 : vector<1x128xf32>
    %cst_40 = arith.constant 1.000000e+00 : f32
    %117 = vector.broadcast %cst_40 : f32 to vector<1x128xf32>
    %118 = arith.addf %117, %116 : vector<1x128xf32>
    %119 = arith.divf %117, %118 : vector<1x128xf32>
    %120 = math.tanh %114 : vector<1x128xf32>
    %121 = vector.extract_strided_slice %119 {offsets = [0, 0], sizes = [1, 32], strides = [1, 1]} : vector<1x128xf32> to vector<1x32xf32>
    %122 = vector.extract_strided_slice %119 {offsets = [0, 32], sizes = [1, 32], strides = [1, 1]} : vector<1x128xf32> to vector<1x32xf32>
    %123 = vector.extract_strided_slice %120 {offsets = [0, 64], sizes = [1, 32], strides = [1, 1]} : vector<1x128xf32> to vector<1x32xf32>
    %124 = vector.extract_strided_slice %119 {offsets = [0, 96], sizes = [1, 32], strides = [1, 1]} : vector<1x128xf32> to vector<1x32xf32>
    %125 = arith.mulf %122, %8 : vector<1x32xf32>
    %126 = arith.mulf %121, %123 : vector<1x32xf32>
    %127 = arith.addf %125, %126 : vector<1x32xf32>
    %128 = math.tanh %127 : vector<1x32xf32>
    %129 = arith.mulf %124, %128 : vector<1x32xf32>
    %cst_41 = arith.constant dense<0.000000e+00> : vector<1x32xf32>
    %130 = tpu.matmul %129, %5, %cst_41 {dimension_numbers = #tpu.dot_dimension_numbers<[1], [0], [0], [1], [0, 0, 1, 1], [], []>} : vector<1x32xf32>, vector<32x32xf32>, vector<1x32xf32> -> vector<1x32xf32>
    %131 = vector.broadcast %130 : vector<1x32xf32> to vector<8x32xf32>
    %132 = arith.addf %16, %131 : vector<8x32xf32>
    %133 = math.tanh %132 : vector<8x32xf32>
    %134 = vector.broadcast %11 : vector<1x32xf32> to vector<8x32xf32>
    %135 = arith.mulf %133, %134 : vector<8x32xf32>
    %cst_42 = arith.constant dense<0.000000e+00> : vector<8xf32>
    %136 = vector.multi_reduction <add>, %135, %cst_42 [1] : vector<8x32xf32> to vector<8xf32>
    %137 = vector.shape_cast %136 : vector<8xf32> to vector<8x1xf32>
    %cst_43 = arith.constant dense<0xFF800000> : vector<1xf32>
    %138 = vector.multi_reduction <maximumf>, %137, %cst_43 [0] : vector<8x1xf32> to vector<1xf32>
    %139 = vector.shape_cast %138 : vector<1xf32> to vector<1x1xf32>
    %140 = vector.broadcast %139 : vector<1x1xf32> to vector<8x1xf32>
    %141 = arith.subf %137, %140 : vector<8x1xf32>
    %142 = math.exp %141 : vector<8x1xf32>
    %cst_44 = arith.constant dense<0.000000e+00> : vector<1xf32>
    %143 = vector.multi_reduction <add>, %142, %cst_44 [0] : vector<8x1xf32> to vector<1xf32>
    %144 = vector.shape_cast %143 : vector<1xf32> to vector<1x1xf32>
    %145 = tpu.reciprocal %144 {approx = true} : vector<1x1xf32> -> vector<1x1xf32>
    %146 = vector.broadcast %145 : vector<1x1xf32> to vector<8x1xf32>
    %147 = arith.mulf %142, %146 : vector<8x1xf32>
    %148 = vector.broadcast %147 : vector<8x1xf32> to vector<8x32xf32>
    %149 = arith.mulf %148, %16 : vector<8x32xf32>
    %cst_45 = arith.constant dense<0.000000e+00> : vector<32xf32>
    %150 = vector.multi_reduction <add>, %149, %cst_45 [0] : vector<8x32xf32> to vector<32xf32>
    %151 = vector.shape_cast %150 : vector<32xf32> to vector<1x32xf32>
    %cst_46 = arith.constant dense<0.000000e+00> : vector<1x32xf32>
    %152 = tpu.matmul %151, %5, %cst_46 {dimension_numbers = #tpu.dot_dimension_numbers<[1], [0], [0], [1], [0, 0, 1, 1], [], []>} : vector<1x32xf32>, vector<32x32xf32>, vector<1x32xf32> -> vector<1x32xf32>
    %153 = vector.broadcast %152 : vector<1x32xf32> to vector<8x32xf32>
    %154 = arith.addf %16, %153 : vector<8x32xf32>
    %155 = math.tanh %154 : vector<8x32xf32>
    %156 = vector.broadcast %11 : vector<1x32xf32> to vector<8x32xf32>
    %157 = arith.mulf %155, %156 : vector<8x32xf32>
    %cst_47 = arith.constant dense<0.000000e+00> : vector<8xf32>
    %158 = vector.multi_reduction <add>, %157, %cst_47 [1] : vector<8x32xf32> to vector<8xf32>
    %159 = vector.shape_cast %158 : vector<8xf32> to vector<8x1xf32>
    %cst_48 = arith.constant dense<0xFF800000> : vector<1xf32>
    %160 = vector.multi_reduction <maximumf>, %159, %cst_48 [0] : vector<8x1xf32> to vector<1xf32>
    %161 = vector.shape_cast %160 : vector<1xf32> to vector<1x1xf32>
    %162 = vector.broadcast %161 : vector<1x1xf32> to vector<8x1xf32>
    %163 = arith.subf %159, %162 : vector<8x1xf32>
    %164 = math.exp %163 : vector<8x1xf32>
    %cst_49 = arith.constant dense<0.000000e+00> : vector<1xf32>
    %165 = vector.multi_reduction <add>, %164, %cst_49 [0] : vector<8x1xf32> to vector<1xf32>
    %166 = vector.shape_cast %165 : vector<1xf32> to vector<1x1xf32>
    %167 = tpu.reciprocal %166 {approx = true} : vector<1x1xf32> -> vector<1x1xf32>
    %168 = vector.broadcast %167 : vector<1x1xf32> to vector<8x1xf32>
    %169 = arith.mulf %164, %168 : vector<8x1xf32>
    %170 = vector.broadcast %169 : vector<8x1xf32> to vector<8x32xf32>
    %171 = arith.mulf %170, %16 : vector<8x32xf32>
    %cst_50 = arith.constant dense<0.000000e+00> : vector<32xf32>
    %172 = vector.multi_reduction <add>, %171, %cst_50 [0] : vector<8x32xf32> to vector<32xf32>
    %173 = vector.shape_cast %172 : vector<32xf32> to vector<1x32xf32>
    %cst_51 = arith.constant dense<0.000000e+00> : vector<1x32xf32>
    %174 = tpu.matmul %173, %4, %cst_51 {dimension_numbers = #tpu.dot_dimension_numbers<[1], [0], [0], [1], [0, 0, 1, 1], [], []>} : vector<1x32xf32>, vector<32x32xf32>, vector<1x32xf32> -> vector<1x32xf32>
    %175 = vector.broadcast %174 : vector<1x32xf32> to vector<8x32xf32>
    %176 = arith.addf %15, %175 : vector<8x32xf32>
    %177 = math.tanh %176 : vector<8x32xf32>
    %178 = vector.broadcast %10 : vector<1x32xf32> to vector<8x32xf32>
    %179 = arith.mulf %177, %178 : vector<8x32xf32>
    %cst_52 = arith.constant dense<0.000000e+00> : vector<8xf32>
    %180 = vector.multi_reduction <add>, %179, %cst_52 [1] : vector<8x32xf32> to vector<8xf32>
    %181 = vector.shape_cast %180 : vector<8xf32> to vector<8x1xf32>
    %cst_53 = arith.constant dense<0xFF800000> : vector<1xf32>
    %182 = vector.multi_reduction <maximumf>, %181, %cst_53 [0] : vector<8x1xf32> to vector<1xf32>
    %183 = vector.shape_cast %182 : vector<1xf32> to vector<1x1xf32>
    %184 = vector.broadcast %183 : vector<1x1xf32> to vector<8x1xf32>
    %185 = arith.subf %181, %184 : vector<8x1xf32>
    %186 = math.exp %185 : vector<8x1xf32>
    %cst_54 = arith.constant dense<0.000000e+00> : vector<1xf32>
    %187 = vector.multi_reduction <add>, %186, %cst_54 [0] : vector<8x1xf32> to vector<1xf32>
    %188 = vector.shape_cast %187 : vector<1xf32> to vector<1x1xf32>
    %189 = tpu.reciprocal %188 {approx = true} : vector<1x1xf32> -> vector<1x1xf32>
    %190 = vector.broadcast %189 : vector<1x1xf32> to vector<8x1xf32>
    %191 = arith.mulf %186, %190 : vector<8x1xf32>
    %192 = vector.broadcast %191 : vector<8x1xf32> to vector<8x32xf32>
    %193 = arith.mulf %192, %0 : vector<8x32xf32>
    %cst_55 = arith.constant dense<0.000000e+00> : vector<32xf32>
    %194 = vector.multi_reduction <add>, %193, %cst_55 [0] : vector<8x32xf32> to vector<32xf32>
    %195 = vector.shape_cast %194 : vector<32xf32> to vector<1x32xf32>
    %196 = arith.mulf %195, %12 : vector<1x32xf32>
    %cst_56 = arith.constant dense<0.000000e+00> : vector<1xf32>
    %197 = vector.multi_reduction <add>, %196, %cst_56 [1] : vector<1x32xf32> to vector<1xf32>
    %198 = vector.shape_cast %197 : vector<1xf32> to vector<1x1xf32>
    %199 = arith.addf %198, %13 : vector<1x1xf32>
    %c1_i32 = arith.constant 1 : i32
    %200 = vector.broadcast %c1_i32 : i32 to vector<1x4xi32>
    %201 = arith.cmpi eq, %20, %200 : vector<1x4xi32>
    %202 = vector.shape_cast %199 : vector<1x1xf32> to vector<1x1xf32>
    %203 = vector.broadcast %202 : vector<1x1xf32> to vector<1x4xf32>
    %204 = arith.select %201, %203, %112 : vector<1x4xi1>, vector<1x4xf32>
    %cst_57 = arith.constant dense<0.000000e+00> : vector<1x128xf32>
    %205 = tpu.matmul %195, %1, %cst_57 {dimension_numbers = #tpu.dot_dimension_numbers<[1], [0], [0], [1], [0, 0, 1, 1], [], []>} : vector<1x32xf32>, vector<32x128xf32>, vector<1x128xf32> -> vector<1x128xf32>
    %206 = arith.addf %205, %18 : vector<1x128xf32>
    %207 = arith.negf %206 : vector<1x128xf32>
    %208 = math.exp %207 : vector<1x128xf32>
    %cst_58 = arith.constant 1.000000e+00 : f32
    %209 = vector.broadcast %cst_58 : f32 to vector<1x128xf32>
    %210 = arith.addf %209, %208 : vector<1x128xf32>
    %211 = arith.divf %209, %210 : vector<1x128xf32>
    %212 = math.tanh %206 : vector<1x128xf32>
    %213 = vector.extract_strided_slice %211 {offsets = [0, 0], sizes = [1, 32], strides = [1, 1]} : vector<1x128xf32> to vector<1x32xf32>
    %214 = vector.extract_strided_slice %211 {offsets = [0, 32], sizes = [1, 32], strides = [1, 1]} : vector<1x128xf32> to vector<1x32xf32>
    %215 = vector.extract_strided_slice %212 {offsets = [0, 64], sizes = [1, 32], strides = [1, 1]} : vector<1x128xf32> to vector<1x32xf32>
    %216 = vector.extract_strided_slice %211 {offsets = [0, 96], sizes = [1, 32], strides = [1, 1]} : vector<1x128xf32> to vector<1x32xf32>
    %217 = arith.mulf %214, %8 : vector<1x32xf32>
    %218 = arith.mulf %213, %215 : vector<1x32xf32>
    %219 = arith.addf %217, %218 : vector<1x32xf32>
    %220 = math.tanh %219 : vector<1x32xf32>
    %221 = arith.mulf %216, %220 : vector<1x32xf32>
    %cst_59 = arith.constant dense<0.000000e+00> : vector<1x32xf32>
    %222 = tpu.matmul %221, %5, %cst_59 {dimension_numbers = #tpu.dot_dimension_numbers<[1], [0], [0], [1], [0, 0, 1, 1], [], []>} : vector<1x32xf32>, vector<32x32xf32>, vector<1x32xf32> -> vector<1x32xf32>
    %223 = vector.broadcast %222 : vector<1x32xf32> to vector<8x32xf32>
    %224 = arith.addf %16, %223 : vector<8x32xf32>
    %225 = math.tanh %224 : vector<8x32xf32>
    %226 = vector.broadcast %11 : vector<1x32xf32> to vector<8x32xf32>
    %227 = arith.mulf %225, %226 : vector<8x32xf32>
    %cst_60 = arith.constant dense<0.000000e+00> : vector<8xf32>
    %228 = vector.multi_reduction <add>, %227, %cst_60 [1] : vector<8x32xf32> to vector<8xf32>
    %229 = vector.shape_cast %228 : vector<8xf32> to vector<8x1xf32>
    %cst_61 = arith.constant dense<0xFF800000> : vector<1xf32>
    %230 = vector.multi_reduction <maximumf>, %229, %cst_61 [0] : vector<8x1xf32> to vector<1xf32>
    %231 = vector.shape_cast %230 : vector<1xf32> to vector<1x1xf32>
    %232 = vector.broadcast %231 : vector<1x1xf32> to vector<8x1xf32>
    %233 = arith.subf %229, %232 : vector<8x1xf32>
    %234 = math.exp %233 : vector<8x1xf32>
    %cst_62 = arith.constant dense<0.000000e+00> : vector<1xf32>
    %235 = vector.multi_reduction <add>, %234, %cst_62 [0] : vector<8x1xf32> to vector<1xf32>
    %236 = vector.shape_cast %235 : vector<1xf32> to vector<1x1xf32>
    %237 = tpu.reciprocal %236 {approx = true} : vector<1x1xf32> -> vector<1x1xf32>
    %238 = vector.broadcast %237 : vector<1x1xf32> to vector<8x1xf32>
    %239 = arith.mulf %234, %238 : vector<8x1xf32>
    %240 = vector.broadcast %239 : vector<8x1xf32> to vector<8x32xf32>
    %241 = arith.mulf %240, %16 : vector<8x32xf32>
    %cst_63 = arith.constant dense<0.000000e+00> : vector<32xf32>
    %242 = vector.multi_reduction <add>, %241, %cst_63 [0] : vector<8x32xf32> to vector<32xf32>
    %243 = vector.shape_cast %242 : vector<32xf32> to vector<1x32xf32>
    %cst_64 = arith.constant dense<0.000000e+00> : vector<1x32xf32>
    %244 = tpu.matmul %243, %5, %cst_64 {dimension_numbers = #tpu.dot_dimension_numbers<[1], [0], [0], [1], [0, 0, 1, 1], [], []>} : vector<1x32xf32>, vector<32x32xf32>, vector<1x32xf32> -> vector<1x32xf32>
    %245 = vector.broadcast %244 : vector<1x32xf32> to vector<8x32xf32>
    %246 = arith.addf %16, %245 : vector<8x32xf32>
    %247 = math.tanh %246 : vector<8x32xf32>
    %248 = vector.broadcast %11 : vector<1x32xf32> to vector<8x32xf32>
    %249 = arith.mulf %247, %248 : vector<8x32xf32>
    %cst_65 = arith.constant dense<0.000000e+00> : vector<8xf32>
    %250 = vector.multi_reduction <add>, %249, %cst_65 [1] : vector<8x32xf32> to vector<8xf32>
    %251 = vector.shape_cast %250 : vector<8xf32> to vector<8x1xf32>
    %cst_66 = arith.constant dense<0xFF800000> : vector<1xf32>
    %252 = vector.multi_reduction <maximumf>, %251, %cst_66 [0] : vector<8x1xf32> to vector<1xf32>
    %253 = vector.shape_cast %252 : vector<1xf32> to vector<1x1xf32>
    %254 = vector.broadcast %253 : vector<1x1xf32> to vector<8x1xf32>
    %255 = arith.subf %251, %254 : vector<8x1xf32>
    %256 = math.exp %255 : vector<8x1xf32>
    %cst_67 = arith.constant dense<0.000000e+00> : vector<1xf32>
    %257 = vector.multi_reduction <add>, %256, %cst_67 [0] : vector<8x1xf32> to vector<1xf32>
    %258 = vector.shape_cast %257 : vector<1xf32> to vector<1x1xf32>
    %259 = tpu.reciprocal %258 {approx = true} : vector<1x1xf32> -> vector<1x1xf32>
    %260 = vector.broadcast %259 : vector<1x1xf32> to vector<8x1xf32>
    %261 = arith.mulf %256, %260 : vector<8x1xf32>
    %262 = vector.broadcast %261 : vector<8x1xf32> to vector<8x32xf32>
    %263 = arith.mulf %262, %16 : vector<8x32xf32>
    %cst_68 = arith.constant dense<0.000000e+00> : vector<32xf32>
    %264 = vector.multi_reduction <add>, %263, %cst_68 [0] : vector<8x32xf32> to vector<32xf32>
    %265 = vector.shape_cast %264 : vector<32xf32> to vector<1x32xf32>
    %cst_69 = arith.constant dense<0.000000e+00> : vector<1x32xf32>
    %266 = tpu.matmul %265, %4, %cst_69 {dimension_numbers = #tpu.dot_dimension_numbers<[1], [0], [0], [1], [0, 0, 1, 1], [], []>} : vector<1x32xf32>, vector<32x32xf32>, vector<1x32xf32> -> vector<1x32xf32>
    %267 = vector.broadcast %266 : vector<1x32xf32> to vector<8x32xf32>
    %268 = arith.addf %15, %267 : vector<8x32xf32>
    %269 = math.tanh %268 : vector<8x32xf32>
    %270 = vector.broadcast %10 : vector<1x32xf32> to vector<8x32xf32>
    %271 = arith.mulf %269, %270 : vector<8x32xf32>
    %cst_70 = arith.constant dense<0.000000e+00> : vector<8xf32>
    %272 = vector.multi_reduction <add>, %271, %cst_70 [1] : vector<8x32xf32> to vector<8xf32>
    %273 = vector.shape_cast %272 : vector<8xf32> to vector<8x1xf32>
    %cst_71 = arith.constant dense<0xFF800000> : vector<1xf32>
    %274 = vector.multi_reduction <maximumf>, %273, %cst_71 [0] : vector<8x1xf32> to vector<1xf32>
    %275 = vector.shape_cast %274 : vector<1xf32> to vector<1x1xf32>
    %276 = vector.broadcast %275 : vector<1x1xf32> to vector<8x1xf32>
    %277 = arith.subf %273, %276 : vector<8x1xf32>
    %278 = math.exp %277 : vector<8x1xf32>
    %cst_72 = arith.constant dense<0.000000e+00> : vector<1xf32>
    %279 = vector.multi_reduction <add>, %278, %cst_72 [0] : vector<8x1xf32> to vector<1xf32>
    %280 = vector.shape_cast %279 : vector<1xf32> to vector<1x1xf32>
    %281 = tpu.reciprocal %280 {approx = true} : vector<1x1xf32> -> vector<1x1xf32>
    %282 = vector.broadcast %281 : vector<1x1xf32> to vector<8x1xf32>
    %283 = arith.mulf %278, %282 : vector<8x1xf32>
    %284 = vector.broadcast %283 : vector<8x1xf32> to vector<8x32xf32>
    %285 = arith.mulf %284, %0 : vector<8x32xf32>
    %cst_73 = arith.constant dense<0.000000e+00> : vector<32xf32>
    %286 = vector.multi_reduction <add>, %285, %cst_73 [0] : vector<8x32xf32> to vector<32xf32>
    %287 = vector.shape_cast %286 : vector<32xf32> to vector<1x32xf32>
    %288 = arith.mulf %287, %12 : vector<1x32xf32>
    %cst_74 = arith.constant dense<0.000000e+00> : vector<1xf32>
    %289 = vector.multi_reduction <add>, %288, %cst_74 [1] : vector<1x32xf32> to vector<1xf32>
    %290 = vector.shape_cast %289 : vector<1xf32> to vector<1x1xf32>
    %291 = arith.addf %290, %13 : vector<1x1xf32>
    %c2_i32 = arith.constant 2 : i32
    %292 = vector.broadcast %c2_i32 : i32 to vector<1x4xi32>
    %293 = arith.cmpi eq, %20, %292 : vector<1x4xi32>
    %294 = vector.shape_cast %291 : vector<1x1xf32> to vector<1x1xf32>
    %295 = vector.broadcast %294 : vector<1x1xf32> to vector<1x4xf32>
    %296 = arith.select %293, %295, %204 : vector<1x4xi1>, vector<1x4xf32>
    %cst_75 = arith.constant dense<0.000000e+00> : vector<1x128xf32>
    %297 = tpu.matmul %287, %1, %cst_75 {dimension_numbers = #tpu.dot_dimension_numbers<[1], [0], [0], [1], [0, 0, 1, 1], [], []>} : vector<1x32xf32>, vector<32x128xf32>, vector<1x128xf32> -> vector<1x128xf32>
    %298 = arith.addf %297, %18 : vector<1x128xf32>
    %299 = arith.negf %298 : vector<1x128xf32>
    %300 = math.exp %299 : vector<1x128xf32>
    %cst_76 = arith.constant 1.000000e+00 : f32
    %301 = vector.broadcast %cst_76 : f32 to vector<1x128xf32>
    %302 = arith.addf %301, %300 : vector<1x128xf32>
    %303 = arith.divf %301, %302 : vector<1x128xf32>
    %304 = math.tanh %298 : vector<1x128xf32>
    %305 = vector.extract_strided_slice %303 {offsets = [0, 0], sizes = [1, 32], strides = [1, 1]} : vector<1x128xf32> to vector<1x32xf32>
    %306 = vector.extract_strided_slice %303 {offsets = [0, 32], sizes = [1, 32], strides = [1, 1]} : vector<1x128xf32> to vector<1x32xf32>
    %307 = vector.extract_strided_slice %304 {offsets = [0, 64], sizes = [1, 32], strides = [1, 1]} : vector<1x128xf32> to vector<1x32xf32>
    %308 = vector.extract_strided_slice %303 {offsets = [0, 96], sizes = [1, 32], strides = [1, 1]} : vector<1x128xf32> to vector<1x32xf32>
    %309 = arith.mulf %306, %8 : vector<1x32xf32>
    %310 = arith.mulf %305, %307 : vector<1x32xf32>
    %311 = arith.addf %309, %310 : vector<1x32xf32>
    %312 = math.tanh %311 : vector<1x32xf32>
    %313 = arith.mulf %308, %312 : vector<1x32xf32>
    %cst_77 = arith.constant dense<0.000000e+00> : vector<1x32xf32>
    %314 = tpu.matmul %313, %5, %cst_77 {dimension_numbers = #tpu.dot_dimension_numbers<[1], [0], [0], [1], [0, 0, 1, 1], [], []>} : vector<1x32xf32>, vector<32x32xf32>, vector<1x32xf32> -> vector<1x32xf32>
    %315 = vector.broadcast %314 : vector<1x32xf32> to vector<8x32xf32>
    %316 = arith.addf %16, %315 : vector<8x32xf32>
    %317 = math.tanh %316 : vector<8x32xf32>
    %318 = vector.broadcast %11 : vector<1x32xf32> to vector<8x32xf32>
    %319 = arith.mulf %317, %318 : vector<8x32xf32>
    %cst_78 = arith.constant dense<0.000000e+00> : vector<8xf32>
    %320 = vector.multi_reduction <add>, %319, %cst_78 [1] : vector<8x32xf32> to vector<8xf32>
    %321 = vector.shape_cast %320 : vector<8xf32> to vector<8x1xf32>
    %cst_79 = arith.constant dense<0xFF800000> : vector<1xf32>
    %322 = vector.multi_reduction <maximumf>, %321, %cst_79 [0] : vector<8x1xf32> to vector<1xf32>
    %323 = vector.shape_cast %322 : vector<1xf32> to vector<1x1xf32>
    %324 = vector.broadcast %323 : vector<1x1xf32> to vector<8x1xf32>
    %325 = arith.subf %321, %324 : vector<8x1xf32>
    %326 = math.exp %325 : vector<8x1xf32>
    %cst_80 = arith.constant dense<0.000000e+00> : vector<1xf32>
    %327 = vector.multi_reduction <add>, %326, %cst_80 [0] : vector<8x1xf32> to vector<1xf32>
    %328 = vector.shape_cast %327 : vector<1xf32> to vector<1x1xf32>
    %329 = tpu.reciprocal %328 {approx = true} : vector<1x1xf32> -> vector<1x1xf32>
    %330 = vector.broadcast %329 : vector<1x1xf32> to vector<8x1xf32>
    %331 = arith.mulf %326, %330 : vector<8x1xf32>
    %332 = vector.broadcast %331 : vector<8x1xf32> to vector<8x32xf32>
    %333 = arith.mulf %332, %16 : vector<8x32xf32>
    %cst_81 = arith.constant dense<0.000000e+00> : vector<32xf32>
    %334 = vector.multi_reduction <add>, %333, %cst_81 [0] : vector<8x32xf32> to vector<32xf32>
    %335 = vector.shape_cast %334 : vector<32xf32> to vector<1x32xf32>
    %cst_82 = arith.constant dense<0.000000e+00> : vector<1x32xf32>
    %336 = tpu.matmul %335, %5, %cst_82 {dimension_numbers = #tpu.dot_dimension_numbers<[1], [0], [0], [1], [0, 0, 1, 1], [], []>} : vector<1x32xf32>, vector<32x32xf32>, vector<1x32xf32> -> vector<1x32xf32>
    %337 = vector.broadcast %336 : vector<1x32xf32> to vector<8x32xf32>
    %338 = arith.addf %16, %337 : vector<8x32xf32>
    %339 = math.tanh %338 : vector<8x32xf32>
    %340 = vector.broadcast %11 : vector<1x32xf32> to vector<8x32xf32>
    %341 = arith.mulf %339, %340 : vector<8x32xf32>
    %cst_83 = arith.constant dense<0.000000e+00> : vector<8xf32>
    %342 = vector.multi_reduction <add>, %341, %cst_83 [1] : vector<8x32xf32> to vector<8xf32>
    %343 = vector.shape_cast %342 : vector<8xf32> to vector<8x1xf32>
    %cst_84 = arith.constant dense<0xFF800000> : vector<1xf32>
    %344 = vector.multi_reduction <maximumf>, %343, %cst_84 [0] : vector<8x1xf32> to vector<1xf32>
    %345 = vector.shape_cast %344 : vector<1xf32> to vector<1x1xf32>
    %346 = vector.broadcast %345 : vector<1x1xf32> to vector<8x1xf32>
    %347 = arith.subf %343, %346 : vector<8x1xf32>
    %348 = math.exp %347 : vector<8x1xf32>
    %cst_85 = arith.constant dense<0.000000e+00> : vector<1xf32>
    %349 = vector.multi_reduction <add>, %348, %cst_85 [0] : vector<8x1xf32> to vector<1xf32>
    %350 = vector.shape_cast %349 : vector<1xf32> to vector<1x1xf32>
    %351 = tpu.reciprocal %350 {approx = true} : vector<1x1xf32> -> vector<1x1xf32>
    %352 = vector.broadcast %351 : vector<1x1xf32> to vector<8x1xf32>
    %353 = arith.mulf %348, %352 : vector<8x1xf32>
    %354 = vector.broadcast %353 : vector<8x1xf32> to vector<8x32xf32>
    %355 = arith.mulf %354, %16 : vector<8x32xf32>
    %cst_86 = arith.constant dense<0.000000e+00> : vector<32xf32>
    %356 = vector.multi_reduction <add>, %355, %cst_86 [0] : vector<8x32xf32> to vector<32xf32>
    %357 = vector.shape_cast %356 : vector<32xf32> to vector<1x32xf32>
    %cst_87 = arith.constant dense<0.000000e+00> : vector<1x32xf32>
    %358 = tpu.matmul %357, %4, %cst_87 {dimension_numbers = #tpu.dot_dimension_numbers<[1], [0], [0], [1], [0, 0, 1, 1], [], []>} : vector<1x32xf32>, vector<32x32xf32>, vector<1x32xf32> -> vector<1x32xf32>
    %359 = vector.broadcast %358 : vector<1x32xf32> to vector<8x32xf32>
    %360 = arith.addf %15, %359 : vector<8x32xf32>
    %361 = math.tanh %360 : vector<8x32xf32>
    %362 = vector.broadcast %10 : vector<1x32xf32> to vector<8x32xf32>
    %363 = arith.mulf %361, %362 : vector<8x32xf32>
    %cst_88 = arith.constant dense<0.000000e+00> : vector<8xf32>
    %364 = vector.multi_reduction <add>, %363, %cst_88 [1] : vector<8x32xf32> to vector<8xf32>
    %365 = vector.shape_cast %364 : vector<8xf32> to vector<8x1xf32>
    %cst_89 = arith.constant dense<0xFF800000> : vector<1xf32>
    %366 = vector.multi_reduction <maximumf>, %365, %cst_89 [0] : vector<8x1xf32> to vector<1xf32>
    %367 = vector.shape_cast %366 : vector<1xf32> to vector<1x1xf32>
    %368 = vector.broadcast %367 : vector<1x1xf32> to vector<8x1xf32>
    %369 = arith.subf %365, %368 : vector<8x1xf32>
    %370 = math.exp %369 : vector<8x1xf32>
    %cst_90 = arith.constant dense<0.000000e+00> : vector<1xf32>
    %371 = vector.multi_reduction <add>, %370, %cst_90 [0] : vector<8x1xf32> to vector<1xf32>
    %372 = vector.shape_cast %371 : vector<1xf32> to vector<1x1xf32>
    %373 = tpu.reciprocal %372 {approx = true} : vector<1x1xf32> -> vector<1x1xf32>
    %374 = vector.broadcast %373 : vector<1x1xf32> to vector<8x1xf32>
    %375 = arith.mulf %370, %374 : vector<8x1xf32>
    %376 = vector.broadcast %375 : vector<8x1xf32> to vector<8x32xf32>
    %377 = arith.mulf %376, %0 : vector<8x32xf32>
    %cst_91 = arith.constant dense<0.000000e+00> : vector<32xf32>
    %378 = vector.multi_reduction <add>, %377, %cst_91 [0] : vector<8x32xf32> to vector<32xf32>
    %379 = vector.shape_cast %378 : vector<32xf32> to vector<1x32xf32>
    %380 = arith.mulf %379, %12 : vector<1x32xf32>
    %cst_92 = arith.constant dense<0.000000e+00> : vector<1xf32>
    %381 = vector.multi_reduction <add>, %380, %cst_92 [1] : vector<1x32xf32> to vector<1xf32>
    %382 = vector.shape_cast %381 : vector<1xf32> to vector<1x1xf32>
    %383 = arith.addf %382, %13 : vector<1x1xf32>
    %c3_i32 = arith.constant 3 : i32
    %384 = vector.broadcast %c3_i32 : i32 to vector<1x4xi32>
    %385 = arith.cmpi eq, %20, %384 : vector<1x4xi32>
    %386 = vector.shape_cast %383 : vector<1x1xf32> to vector<1x1xf32>
    %387 = vector.broadcast %386 : vector<1x1xf32> to vector<1x4xf32>
    %388 = arith.select %385, %387, %296 : vector<1x4xi1>, vector<1x4xf32>
    %c0_93 = arith.constant 0 : index
    %c0_94 = arith.constant 0 : index
    %389 = vector.load %arg4[%c0_93, %c0_94] : memref<1x4xf32, #tpu.memory_space<vmem>>, vector<1x4xf32>
    tpu.vector_store %arg4[%c0_93, %c0_94], %388 {strides = array<i32>} : memref<1x4xf32, #tpu.memory_space<vmem>>, vector<1x4xf32>,
    return
  }
}

</mosaic_0001>

<bundles_post_ra>
// kernel: ptr_scorer_pallas.1
= control target key start
LH: loop header
LB: loop body
LE: loop exit
PB: predicated region body
PF: predicated region fallthrough
CT: control target
= control target key end

     0   :  { %v2632_v3 = vmov 0.0|0.0   ;;  %vm2633_vm0 = vmmov 0   ;;  %v2634_v9 = vmov 0.0   ;;  %s3050_s0 = inlined_call_operand.vmem [shape: f32[8,32], index: 0, kind: input, shape index: {}]   ;;  %s3051_s1 = inlined_call_operand.vmem [shape: f32[64,128], index: 1, kind: input, shape index: {}]   ;;  %s3052_s2 = inlined_call_operand.vmem [shape: f32[64,64], index: 2, kind: input, shape index: {}]   ;;  %s3053_s3 = inlined_call_operand.vmem [shape: f32[8,128], index: 3, kind: input, shape index: {}]   ;;  %s3054_s4 = inlined_call_operand.hbm [shape: f32[1,4], index: 4, kind: output, shape index: {}]  }
   0x1   :  { %v27_v0 = vld [vmem:[%s3052_s2] sm:$0xff]  ;;  %v28_v1 = vld [vmem:[%s3052_s2 + $0x8] sm:$0xff]  ;;  %v29_v2 = vld [vmem:[%s3052_s2 + $0x10] sm:$0xff]  ;;  %2374 = vmatprep.subr.bf16.mxu0 %v2632_v3  ;;  %2380 = vmatprep.subr.bf16.mxu1 %v2632_v3 }
   0x2   :  { %v2375_v4 = vpack.c.bf16 %v28_v1, %v27_v0  ;;  %v30_v5 = vld [vmem:[%s3052_s2 + $0x18] sm:$0xff]  ;;  %v23_v6 = vld [vmem:[%s3051_s1 + $0x20] sm:$0xff]  ;;  %v24_v7 = vld [vmem:[%s3051_s1 + $0x28] sm:$0xff]  ;;  %2184 = vmatprep.mubr.msk.f32.mxu0 %vm2633_vm0, %v2634_v9  ;;  %2195 = vmatprep.mubr.msk.f32.mxu1 %vm2633_vm0, %v2634_v9 }
   0x3   :  { %v2381_v8 = vpack.c.bf16 %v24_v7, %v23_v6  ;;  %v2378_v10 = vpack.c.bf16 %v30_v5, %v29_v2  ;;  %v25_v11 = vld [vmem:[%s3051_s1 + $0x30] sm:$0xff]  ;;  %v26_v12 = vld [vmem:[%s3051_s1 + $0x38] sm:$0xff]  ;;  %v19_v13 = vld [vmem:[%s3051_s1] sm:$0xff] }
   0x4   :  { %2376 = vmatpush3.bf16.msra.mxu0 %v2375_v4  ;;  %v20_v14 = vld [vmem:[%s3051_s1 + $0x8] sm:$0xff]  ;;  %v2384_v15 = vpack.c.bf16 %v26_v12, %v25_v11 }
   0x5   :  { %2377 = vmatprep.subr.bf16.mxu0 %v2632_v3  ;;  %2382 = vmatpush3.bf16.msra.mxu1 %v2381_v8 }
   0x6   :  { %2383 = vmatprep.subr.bf16.mxu1 %v2632_v3 }
   0x7   :  { %9 = vsyncpa [#allocation3], 0  ;;  %v2706_v16 = vld [vmem:[%s3050_s0] sm:$0xff]  ;;  %vm43_vm1 = vcmask 261120   ;;  %v2708_v17 = vpack.c.bf16 %v20_v14, %v19_v13  ;;  %v21_v19 = vld [vmem:[%s3051_s1 + $0x10] sm:$0xff]  ;;  %s2635_s20 = smov 64   ;;  %v190_v1 = vlaneseq }
   0x8   :  { %2379 = vmatpush3.bf16.msra.mxu0 %v2378_v10  ;;  %v36_v18 = vld [vmem:[%s3053_s3 + $0x1] sm:$0x1]  ;;  %v22_v20 = vld [vmem:[%s3051_s1 + $0x18] sm:$0xff]  ;;  %v38_v22 = vld [vmem:[%s3053_s3 + $0x3] sm:$0x1]  ;;  %s2636_s23 = smov 32  }
   0x9   :  { %2386 = vmatprep.subr.bf16.mxu0 %v2632_v3  ;;  %2385 = vmatpush3.bf16.msra.mxu1 %v2384_v15  ;;  %v2725_v21 = vpack.c.bf16 %v22_v20, %v21_v19  ;;  %v35_v26 = vld [vmem:[%s3053_s3] sm:$0x1]  ;;  %v37_v33 = vld [vmem:[%s3053_s3 + $0x2] sm:$0x1]  ;;  %v32_v41 = vld [vmem:[%s3052_s2 + $0x28] sm:$0xff]  ;;  %s2637_s6 = smov 96  }
   0xa   :  { %2392 = vmatprep.subr.bf16.mxu1 %v2632_v3  ;;  %v31_v40 = vld [vmem:[%s3052_s2 + $0x20] sm:$0xff]  ;;  %v33_v44 = vld [vmem:[%s3052_s2 + $0x30] sm:$0xff]  ;;  %v34_v45 = vld [vmem:[%s3052_s2 + $0x38] sm:$0xff]  ;;  %v385_v2 = vshrl.u32 %v190_v1, 7  ;;  %vm428_vm2 = vcmask 523520   ;;  %vm669_vm3 = vcmask 253952  }
   0xb   :  { %2185 = vmatmul.mubr.msk.f32.vlgmr.msra.gmra.mrb[0].mxu0 %vm43_vm1, %v2706_v16  ;;  %v2490_v42 = vpack.i.bf16 %v32_v41, %v31_v40  ;;  %v2760_v43 = vpack.c.bf16 %v32_v41, %v31_v40  ;;  %v2768_v46 = vpack.c.bf16 %v34_v45, %v33_v44  ;;  %v2495_v56 = vpack.i.bf16 %v34_v45, %v33_v44  ;;  %v2067_v0 = vld [vmem:[%s3053_s3 + $0x5] ss:$0 sm:$0xff] }
   0xc   :  { %2388 = vmatpush3.bf16.msra.mxu0 %v2708_v17  ;;  %2196 = vmatmul.mubr.msk.f32.vlgmr.msra.gmra.mrb[0].mxu1 %vm43_vm1, %v36_v18  ;;  %v2801_v4 = vsub.s32 0, %v385_v2  ;;  %vm2046_vm8 = vcmask 24576  }
   0xd   :  { %2389 = vmatprep.subr.bf16.mxu0 %v2632_v3  ;;  %2206 = vmatprep.mubr.msk.f32.mxu0 %vm2633_vm0, %v2634_v9 }
   0xe   :  { %2217 = vmatprep.mubr.msk.f32.mxu1 %vm2633_vm0, %v2634_v9 }
  0x10   :  { %2391 = vmatpush3.bf16.msra.mxu0 %v2725_v21 }
  0x11   :  { %2398 = vmatprep.subr.bf16.mxu0 %v2632_v3 }
  0x13   :  { %2207 = vmatmul.mubr.msk.f32.vlgmr.msra.gmra.mrb[2].mxu0 %vm43_vm1, %v38_v22 }
  0x14   :  { %2228 = vmatprep.mubr.msk.f32.mxu0 %vm2633_vm0, %v2634_v9 }
  0xde   :  { %v2740_v23 = vpop.f32.mrb[0].mxu0 }
  0xdf   :  { %v2186_v24 = vpop.f32.mrb[1].mxu0  ;;  %v186_v25 = vpop.f32.mrb[0].mxu1 }
  0xe0   :  { %v2197_v27 = vpop.f32.mrb[1].mxu1  ;;  %v2745_v28 = vadd.f32 %v186_v25, %v35_v26 }
  0xe6   :  { %v261_v29 = vpop.f32.mrb[2].mxu0 }
  0xe7   :  { %v262_v30 = vadd.f32 %v261_v29, %v2745_v28  ;;  %v2208_v31 = vpop.f32.mrb[3].mxu0 }
  0xe9   :  { %2502 = vtanh.f32 %v262_v30  ;;  %v2065_v34 = vmul.f32 -1.442695, %v262_v30 }
  0xeb   :  { %2504 = vpow2.f32 %v2065_v34 }
  0xf3   :  { %v2503_v32 = vpop.eup %2502 }
  0xf4   :  { %278 = vrot.lane.b32.xlu0 %v2503_v32, %s2635_s20 }
  0xf5   :  { %v2505_v35 = vpop.eup %2504 }
  0xf6   :  { %v268_v36 = vadd.f32 1.0, %v2505_v35 }
  0xf8   :  { %273 = vrot.lane.b32.xlu0 %v37_v33, %s2636_s23  ;;  %2506 = vrcp.f32 %v268_v36 }
  0xfc   :  { %2491 = vrot.lane.b32.xlu0 %v2490_v42, %s2637_s6 }
 0x102   :  { %v2507_v37 = vpop.eup %2506 }
 0x166   :  { %v279_v38 = vpop.permute.xlu0 %278 }
 0x167   :  { %v281_v39 = vmul.f32 %v2507_v37, %v279_v38 }
 0x169   :  { %283 = vrot.lane.b32.xlu1 %v281_v39, %s2636_s23 }
 0x16a   :  { %v2771_v47 = vpop.permute.xlu0 %273 }
 0x16b   :  { %v276_v48 = vmul.f32 %v2507_v37, %v2771_v47 }
 0x16e   :  { %v2492_v51 = vpop.permute.xlu0 %2491 }
 0x16f   :  { %v2494_v52 = vunpack.i.h.bf16 %v2492_v51  ;;  %v2493_v53 = vunpack.i.l.bf16 %v2492_v51 }
 0x171   :  { %v2774_v54 = vpack.c.bf16 %v2494_v52, %v2493_v53 }
 0x173   :  { %2394 = vmatpush3.bf16.msra.mxu1 %v2774_v54  ;;  %2400 = vmatpush3.bf16.msra.mxu0 %v2774_v54 }
 0x174   :  { %2395 = vmatprep.subr.bf16.mxu1 %v2632_v3  ;;  %2401 = vmatprep.subr.bf16.mxu0 %v2632_v3 }
 0x1db   :  { %v284_v49 = vpop.permute.xlu1 %283 }
 0x1dc   :  { %v286_v50 = vadd.f32 %v284_v49, %v276_v48 }
 0x1de   :  { %2508 = vtanh.f32 %v286_v50 }
 0x1e8   :  { %v2509_v55 = vpop.eup %2508 }
 0x1e9   :  { %289 = vrot.lane.b32.xlu1 %v2509_v55, %s2635_s20 }
 0x1ed   :  { %2496 = vrot.lane.b32.xlu1 %v2495_v56, %s2637_s6 }
 0x25b   :  { %v290_v57 = vpop.permute.xlu1 %289 }
 0x25c   :  { %v292_v58 = vmul.f32 %v2507_v37, %v290_v57 }
 0x25e   :  { %294 = vrot.lane.b32.xlu0 %v292_v58, %s2636_s23 }
 0x25f   :  { %v2497_v59 = vpop.permute.xlu1 %2496 }
 0x260   :  { %v2499_v60 = vunpack.i.h.bf16 %v2497_v59  ;;  %v2498_v61 = vunpack.i.l.bf16 %v2497_v59 }
 0x262   :  { %v2783_v62 = vpack.c.bf16 %v2499_v60, %v2498_v61  ;;  %399 = vrot.lane.b32.xlu0 %v2067_v0, %s2636_s23 }
 0x264   :  { %2397 = vmatpush3.bf16.msra.mxu1 %v2783_v62  ;;  %2403 = vmatpush3.bf16.msra.mxu0 %v2783_v62 }
 0x265   :  { %2404 = vmatprep.subr.bf16.mxu1 %v2632_v3  ;;  %2410 = vmatprep.subr.bf16.mxu0 %v2632_v3 }
 0x2d0   :  { %v295_v63 = vpop.permute.xlu0 %294 }
 0x2d1   :  { %2218 = vmatmul.mubr.msk.f32.vlgmr.msra.gmra.mrb[2].mxu1 %vm43_vm1, %v295_v63 }
 0x2d2   :  { %2406 = vmatpush3.bf16.msra.mxu1 %v2760_v43  ;;  %2239 = vmatprep.mubr.msk.f32.mxu1 %vm2633_vm0, %v2634_v9 }
 0x2d3   :  { %2407 = vmatprep.subr.bf16.mxu1 %v2632_v3 }
 0x2d4   :  { %v2806_v11 = vpop.permute.xlu0 %399 }
 0x2d6   :  { %2409 = vmatpush3.bf16.msra.mxu1 %v2768_v46 }
 0x2d7   :  { %2416 = vmatprep.subr.bf16.mxu1 %v2632_v3 }
 0x3a4   :  { %v380_v5 = vpop.f32.mrb[2].mxu1 }
 0x3a5   :  { %v387_v6 = vrot.slane %v380_v5, %v2801_v4  ;;  %v2219_v7 = vpop.f32.mrb[3].mxu1 }
 0x3a7   :  { %389 = vrot.lane.b32.xlu1 %v387_v6, %s2636_s23 }
 0x419   :  { %v390_v8 = vpop.permute.xlu1 %389 }
 0x41a   :  { %v392_v10 = vadd.f32 %v390_v8, %v2740_v23 }
 0x41c   :  { %2510 = vtanh.f32 %v392_v10 }
 0x426   :  { %v2511_v12 = vpop.eup %2510 }
 0x427   :  { %v402_v13 = vmul.f32 %v2511_v12, %v2806_v11 }
 0x429   :  { %404 = vrot.lane.b32.xlu1 %v402_v13, %s2637_s6 }
 0x49b   :  { %v405_v14 = vpop.permute.xlu1 %404 }
 0x49c   :  { %v407_v15 = vsel %vm43_vm1, %v405_v14, 0.0 }
 0x49d   :  { %408 = vadd.xlane.f32.xlu0 %v407_v15 }
 0x52a   :  { %v409_v18 = vpop.xlane.xlu0 %408 }
 0x52b   :  { %v410_v19 = vrot.slane %v409_v18, 4 }
 0x52d   :  { %v411_v20 = vmax.f32 %v409_v18, %v410_v19 }
 0x52f   :  { %v412_v22 = vrot.slane %v411_v20, 2 }
 0x531   :  { %v413_v24 = vmax.f32 %v411_v20, %v412_v22 }
 0x533   :  { %v414_v25 = vrot.slane %v413_v24, 1 }
 0x535   :  { %v415_v26 = vmax.f32 %v413_v24, %v414_v25 }
 0x537   :  { %v416_v27 = vsub.f32 %v409_v18, %v415_v26 }
 0x539   :  { %v417_v29 = vmul.f32 1.442695, %v416_v27 }
 0x53b   :  { %2512 = vpow2.f32 %v417_v29 }
 0x545   :  { %v2513_v30 = vpop.eup %2512 }
 0x546   :  { %v419_v31 = vrot.slane %v2513_v30, 4 }
 0x548   :  { %v420_v32 = vadd.f32 %v2513_v30, %v419_v31 }
 0x54a   :  { %v421_v33 = vrot.slane %v420_v32, 2 }
 0x54c   :  { %v422_v34 = vadd.f32 %v421_v33, %v420_v32 }
 0x54e   :  { %v423_v35 = vrot.slane %v422_v34, 1 }
 0x550   :  { %v424_v36 = vadd.f32 %v423_v35, %v422_v34 }
 0x552   :  { %2514 = vrcp.f32 %v424_v36 }
 0x55c   :  { %v2515_v37 = vpop.eup %2514 }
 0x55d   :  { %v426_v38 = vmul.f32 %v2515_v37, %v2513_v30 }
 0x55f   :  { %v427_v39 = vmul.f32 %v426_v38, %v2740_v23 }
 0x561   :  { %v429_v40 = vsel %vm428_vm2, %v427_v39, 0.0  ;;  %v2842_v39 = vld [vmem:[%s3053_s3 + $0x4] ss:$0 sm:$0xff] }
 0x562   :  { %v430_v41 = vrot.slane %v429_v40, 4 }
 0x564   :  { %v431_v42 = vadd.f32 %v430_v41, %v429_v40 }
 0x566   :  { %v432_v44 = vrot.slane %v431_v42, 2 }
 0x568   :  { %v433_v45 = vadd.f32 %v432_v44, %v431_v42 }
 0x56a   :  { %v434_v48 = vrot.slane %v433_v45, 1 }
 0x56c   :  { %v435_v49 = vadd.f32 %v434_v48, %v433_v45 }
 0x56e   :  { %437 = vrot.lane.b32.xlu1 %v435_v49, %s2637_s6 }
 0x5e0   :  { %v438_v50 = vpop.permute.xlu1 %437 }
 0x5e1   :  { %2229 = vmatmul.mubr.msk.f32.vlgmr.msra.gmra.mrb[4].mxu0 %vm43_vm1, %v438_v50 }
 0x5e2   :  { %2412 = vmatpush3.bf16.msra.mxu0 %v2708_v17  ;;  %2250 = vmatprep.mubr.msk.f32.mxu0 %vm2633_vm0, %v2634_v9 }
 0x5e3   :  { %2413 = vmatprep.subr.bf16.mxu0 %v2632_v3 }
 0x5e6   :  { %2415 = vmatpush3.bf16.msra.mxu0 %v2725_v21 }
 0x5e7   :  { %2422 = vmatprep.subr.bf16.mxu0 %v2632_v3 }
 0x6b4   :  { %v507_v51 = vpop.f32.mrb[4].mxu0 }
 0x6b5   :  { %v514_v52 = vrot.slane %v507_v51, %v2801_v4  ;;  %v2230_v53 = vpop.f32.mrb[5].mxu0 }
 0x6b7   :  { %516 = vrot.lane.b32.xlu1 %v514_v52, %s2636_s23 }
 0x729   :  { %v517_v55 = vpop.permute.xlu1 %516 }
 0x72a   :  { %v519_v56 = vadd.f32 %v517_v55, %v2740_v23 }
 0x72c   :  { %2516 = vtanh.f32 %v519_v56 }
 0x736   :  { %v2517_v57 = vpop.eup %2516 }
 0x737   :  { %v521_v58 = vmul.f32 %v2517_v57, %v2806_v11 }
 0x739   :  { %523 = vrot.lane.b32.xlu1 %v521_v58, %s2637_s6 }
 0x7ab   :  { %v524_v59 = vpop.permute.xlu1 %523 }
 0x7ac   :  { %v526_v60 = vsel %vm43_vm1, %v524_v59, 0.0 }
 0x7ad   :  { %527 = vadd.xlane.f32.xlu1 %v526_v60 }
 0x83a   :  { %v528_v61 = vpop.xlane.xlu1 %527 }
 0x83b   :  { %v529_v63 = vrot.slane %v528_v61, 4 }
 0x83d   :  { %v530_v0 = vmax.f32 %v528_v61, %v529_v63 }
 0x83f   :  { %v531_v2 = vrot.slane %v530_v0, 2 }
 0x841   :  { %v532_v5 = vmax.f32 %v530_v0, %v531_v2 }
 0x843   :  { %v533_v6 = vrot.slane %v532_v5, 1 }
 0x845   :  { %v534_v7 = vmax.f32 %v532_v5, %v533_v6 }
 0x847   :  { %v535_v8 = vsub.f32 %v528_v61, %v534_v7 }
 0x849   :  { %v536_v10 = vmul.f32 1.442695, %v535_v8 }
 0x84b   :  { %2518 = vpow2.f32 %v536_v10 }
 0x855   :  { %v2519_v12 = vpop.eup %2518 }
 0x856   :  { %v538_v13 = vrot.slane %v2519_v12, 4 }
 0x858   :  { %v539_v14 = vadd.f32 %v2519_v12, %v538_v13 }
 0x85a   :  { %v540_v15 = vrot.slane %v539_v14, 2 }
 0x85c   :  { %v541_v18 = vadd.f32 %v540_v15, %v539_v14 }
 0x85e   :  { %v542_v19 = vrot.slane %v541_v18, 1 }
 0x860   :  { %v543_v20 = vadd.f32 %v542_v19, %v541_v18 }
 0x862   :  { %2520 = vrcp.f32 %v543_v20 }
 0x86c   :  { %v2521_v22 = vpop.eup %2520 }
 0x86d   :  { %v545_v24 = vmul.f32 %v2521_v22, %v2519_v12 }
 0x86f   :  { %v546_v25 = vmul.f32 %v545_v24, %v2740_v23 }
 0x871   :  { %v547_v26 = vsel %vm428_vm2, %v546_v25, 0.0 }
 0x872   :  { %v548_v27 = vrot.slane %v547_v26, 4 }
 0x874   :  { %v549_v29 = vadd.f32 %v548_v27, %v547_v26 }
 0x876   :  { %v550_v30 = vrot.slane %v549_v29, 2 }
 0x878   :  { %v551_v31 = vadd.f32 %v550_v30, %v549_v29 }
 0x87a   :  { %v552_v32 = vrot.slane %v551_v31, 1 }
 0x87c   :  { %v553_v33 = vadd.f32 %v552_v32, %v551_v31 }
 0x87e   :  { %555 = vrot.lane.b32.xlu0 %v553_v33, %s2637_s6 }
 0x8f0   :  { %v556_v34 = vpop.permute.xlu0 %555 }
 0x8f1   :  { %2240 = vmatmul.mubr.msk.f32.vlgmr.msra.gmra.mrb[4].mxu1 %vm43_vm1, %v556_v34 }
 0x8f2   :  { %2418 = vmatpush3.bf16.msra.mxu1 %v2774_v54  ;;  %2261 = vmatprep.mubr.msk.f32.mxu1 %vm2633_vm0, %v2634_v9 }
 0x8f3   :  { %2419 = vmatprep.subr.bf16.mxu1 %v2632_v3 }
 0x8f6   :  { %2421 = vmatpush3.bf16.msra.mxu1 %v2783_v62 }
 0x8f7   :  { %2428 = vmatprep.subr.bf16.mxu1 %v2632_v3 }
 0x9c4   :  { %v625_v35 = vpop.f32.mrb[4].mxu1 }
 0x9c5   :  { %v632_v36 = vrot.slane %v625_v35, %v2801_v4  ;;  %v2241_v37 = vpop.f32.mrb[5].mxu1 }
 0x9c7   :  { %v633_v38 = vadd.f32 %v632_v36, %v2740_v23 }
 0x9c9   :  { %2522 = vtanh.f32 %v633_v38 }
 0x9d3   :  { %v2523_v40 = vpop.eup %2522 }
 0x9d4   :  { %v639_v41 = vmul.f32 %v2523_v40, %v2842_v39 }
 0x9d6   :  { %v640_v42 = vsel %vm43_vm1, %v639_v41, 0.0 }
 0x9d7   :  { %641 = vadd.xlane.f32.xlu1 %v640_v42 }
 0xa64   :  { %v642_v44 = vpop.xlane.xlu1 %641 }
 0xa65   :  { %v643_v45 = vrot.slane %v642_v44, 4 }
 0xa67   :  { %v644_v48 = vmax.f32 %v642_v44, %v643_v45 }
 0xa69   :  { %v645_v49 = vrot.slane %v644_v48, 2 }
 0xa6b   :  { %v646_v50 = vmax.f32 %v644_v48, %v645_v49 }
 0xa6d   :  { %v647_v51 = vrot.slane %v646_v50, 1 }
 0xa6f   :  { %v648_v52 = vmax.f32 %v646_v50, %v647_v51 }
 0xa71   :  { %v649_v53 = vsub.f32 %v642_v44, %v648_v52 }
 0xa73   :  { %v650_v55 = vmul.f32 1.442695, %v649_v53 }
 0xa75   :  { %2524 = vpow2.f32 %v650_v55 }
 0xa7f   :  { %v2525_v56 = vpop.eup %2524 }
 0xa80   :  { %v652_v57 = vrot.slane %v2525_v56, 4 }
 0xa82   :  { %v653_v58 = vadd.f32 %v2525_v56, %v652_v57 }
 0xa84   :  { %v654_v59 = vrot.slane %v653_v58, 2 }
 0xa86   :  { %v655_v60 = vadd.f32 %v654_v59, %v653_v58 }
 0xa88   :  { %v656_v61 = vrot.slane %v655_v60, 1 }
 0xa8a   :  { %v657_v63 = vadd.f32 %v656_v61, %v655_v60 }
 0xa8c   :  { %2526 = vrcp.f32 %v657_v63 }
 0xa96   :  { %v2527_v0 = vpop.eup %2526 }
 0xa97   :  { %v659_v2 = vmul.f32 %v2527_v0, %v2525_v56 }
 0xa99   :  { %v660_v5 = vmul.f32 %v659_v2, %v2706_v16 }
 0xa9b   :  { %v661_v6 = vsel %vm43_vm1, %v660_v5, 0.0 }
 0xa9c   :  { %v662_v7 = vrot.slane %v661_v6, 4 }
 0xa9e   :  { %v663_v8 = vadd.f32 %v662_v7, %v661_v6 }
 0xaa0   :  { %v664_v10 = vrot.slane %v663_v8, 2 }
 0xaa2   :  { %v665_v12 = vadd.f32 %v664_v10, %v663_v8 }
 0xaa4   :  { %v666_v13 = vrot.slane %v665_v12, 1 }
 0xaa6   :  { %v2848_v14 = vadd.f32 %v666_v13, %v665_v12 }
 0xaa8   :  { %2251 = vmatmul.mubr.msk.f32.vlgmr.msra.gmra.mrb[6].mxu0 %vm43_vm1, %v2848_v14 }
 0xaa9   :  { %2424 = vmatpush3.bf16.msra.mxu0 %v2774_v54  ;;  %2272 = vmatprep.mubr.msk.f32.mxu0 %vm2633_vm0, %v2634_v9 }
 0xaaa   :  { %2425 = vmatprep.subr.bf16.mxu0 %v2632_v3 }
 0xaad   :  { %2427 = vmatpush3.bf16.msra.mxu0 %v2783_v62 }
 0xaae   :  { %2434 = vmatprep.subr.bf16.mxu0 %v2632_v3 }
 0xb7b   :  { %v750_v15 = vpop.f32.mrb[6].mxu0 }
 0xb7c   :  { %v751_v18 = vadd.f32 %v750_v15, %v2745_v28  ;;  %v2252_v19 = vpop.f32.mrb[7].mxu0 }
 0xb7e   :  { %2528 = vtanh.f32 %v751_v18  ;;  %v2072_v22 = vmul.f32 -1.442695, %v751_v18 }
 0xb80   :  { %2530 = vpow2.f32 %v2072_v22 }
 0xb88   :  { %v2529_v20 = vpop.eup %2528 }
 0xb89   :  { %763 = vrot.lane.b32.xlu1 %v2529_v20, %s2635_s20 }
 0xb8a   :  { %v2531_v24 = vpop.eup %2530 }
 0xb8b   :  { %v757_v25 = vadd.f32 1.0, %v2531_v24 }
 0xb8d   :  { %2532 = vrcp.f32 %v757_v25 }
 0xb97   :  { %v2533_v26 = vpop.eup %2532 }
 0xb98   :  { %v761_v30 = vmul.f32 %v2533_v26, %v2771_v47 }
 0xbfb   :  { %v764_v27 = vpop.permute.xlu1 %763 }
 0xbfc   :  { %v766_v29 = vmul.f32 %v2533_v26, %v764_v27 }
 0xbfe   :  { %768 = vrot.lane.b32.xlu0 %v766_v29, %s2636_s23 }
 0xc70   :  { %v769_v31 = vpop.permute.xlu0 %768 }
 0xc71   :  { %v771_v32 = vadd.f32 %v769_v31, %v761_v30 }
 0xc73   :  { %2534 = vtanh.f32 %v771_v32 }
 0xc7d   :  { %v2535_v33 = vpop.eup %2534 }
 0xc7e   :  { %774 = vrot.lane.b32.xlu0 %v2535_v33, %s2635_s20 }
 0xcf0   :  { %v775_v34 = vpop.permute.xlu0 %774 }
 0xcf1   :  { %v777_v35 = vmul.f32 %v2533_v26, %v775_v34 }
 0xcf3   :  { %779 = vrot.lane.b32.xlu0 %v777_v35, %s2636_s23 }
 0xd65   :  { %v780_v36 = vpop.permute.xlu0 %779 }
 0xd66   :  { %2262 = vmatmul.mubr.msk.f32.vlgmr.msra.gmra.mrb[6].mxu1 %vm43_vm1, %v780_v36 }
 0xd67   :  { %2430 = vmatpush3.bf16.msra.mxu1 %v2760_v43  ;;  %2283 = vmatprep.mubr.msk.f32.mxu1 %vm2633_vm0, %v2634_v9 }
 0xd68   :  { %2431 = vmatprep.subr.bf16.mxu1 %v2632_v3 }
 0xd6b   :  { %2433 = vmatpush3.bf16.msra.mxu1 %v2768_v46 }
 0xd6c   :  { %2440 = vmatprep.subr.bf16.mxu1 %v2632_v3 }
 0xe39   :  { %v849_v37 = vpop.f32.mrb[6].mxu1 }
 0xe3a   :  { %v856_v38 = vrot.slane %v849_v37, %v2801_v4  ;;  %v2263_v40 = vpop.f32.mrb[7].mxu1 }
 0xe3c   :  { %858 = vrot.lane.b32.xlu0 %v856_v38, %s2636_s23 }
 0xeae   :  { %v859_v41 = vpop.permute.xlu0 %858 }
 0xeaf   :  { %v861_v42 = vadd.f32 %v859_v41, %v2740_v23 }
 0xeb1   :  { %2536 = vtanh.f32 %v861_v42 }
 0xebb   :  { %v2537_v44 = vpop.eup %2536 }
 0xebc   :  { %v863_v45 = vmul.f32 %v2537_v44, %v2806_v11 }
 0xebe   :  { %865 = vrot.lane.b32.xlu0 %v863_v45, %s2637_s6 }
 0xf30   :  { %v866_v48 = vpop.permute.xlu0 %865 }
 0xf31   :  { %v868_v49 = vsel %vm43_vm1, %v866_v48, 0.0 }
 0xf32   :  { %869 = vadd.xlane.f32.xlu1 %v868_v49 }
 0xfbf   :  { %v870_v50 = vpop.xlane.xlu1 %869 }
 0xfc0   :  { %v871_v51 = vrot.slane %v870_v50, 4 }
 0xfc2   :  { %v872_v52 = vmax.f32 %v870_v50, %v871_v51 }
 0xfc4   :  { %v873_v53 = vrot.slane %v872_v52, 2 }
 0xfc6   :  { %v874_v55 = vmax.f32 %v872_v52, %v873_v53 }
 0xfc8   :  { %v875_v56 = vrot.slane %v874_v55, 1 }
 0xfca   :  { %v876_v57 = vmax.f32 %v874_v55, %v875_v56 }
 0xfcc   :  { %v877_v58 = vsub.f32 %v870_v50, %v876_v57 }
 0xfce   :  { %v878_v59 = vmul.f32 1.442695, %v877_v58 }
 0xfd0   :  { %2538 = vpow2.f32 %v878_v59 }
 0xfda   :  { %v2539_v60 = vpop.eup %2538 }
 0xfdb   :  { %v880_v61 = vrot.slane %v2539_v60, 4 }
 0xfdd   :  { %v881_v63 = vadd.f32 %v2539_v60, %v880_v61 }
 0xfdf   :  { %v882_v0 = vrot.slane %v881_v63, 2 }
 0xfe1   :  { %v883_v2 = vadd.f32 %v882_v0, %v881_v63 }
 0xfe3   :  { %v884_v5 = vrot.slane %v883_v2, 1 }
 0xfe5   :  { %v885_v6 = vadd.f32 %v884_v5, %v883_v2 }
 0xfe7   :  { %2540 = vrcp.f32 %v885_v6 }
 0xff1   :  { %v2541_v7 = vpop.eup %2540 }
 0xff2   :  { %v887_v8 = vmul.f32 %v2541_v7, %v2539_v60 }
 0xff4   :  { %v888_v10 = vmul.f32 %v887_v8, %v2740_v23 }
 0xff6   :  { %v889_v12 = vsel %vm428_vm2, %v888_v10, 0.0 }
 0xff7   :  { %v890_v13 = vrot.slane %v889_v12, 4 }
 0xff9   :  { %v891_v15 = vadd.f32 %v890_v13, %v889_v12 }
 0xffb   :  { %v892_v18 = vrot.slane %v891_v15, 2 }
 0xffd   :  { %v893_v19 = vadd.f32 %v892_v18, %v891_v15 }
 0xfff   :  { %v894_v20 = vrot.slane %v893_v19, 1 }
0x1001   :  { %v895_v22 = vadd.f32 %v894_v20, %v893_v19 }
0x1003   :  { %897 = vrot.lane.b32.xlu0 %v895_v22, %s2637_s6 }
0x1075   :  { %v898_v24 = vpop.permute.xlu0 %897 }
0x1076   :  { %2273 = vmatmul.mubr.msk.f32.vlgmr.msra.gmra.mrb[8].mxu0 %vm43_vm1, %v898_v24 }
0x1077   :  { %2436 = vmatpush3.bf16.msra.mxu0 %v2708_v17  ;;  %2294 = vmatprep.mubr.msk.f32.mxu0 %vm2633_vm0, %v2634_v9 }
0x1078   :  { %2437 = vmatprep.subr.bf16.mxu0 %v2632_v3 }
0x107b   :  { %2439 = vmatpush3.bf16.msra.mxu0 %v2725_v21 }
0x107c   :  { %2446 = vmatprep.subr.bf16.mxu0 %v2632_v3 }
0x1149   :  { %v967_v25 = vpop.f32.mrb[8].mxu0 }
0x114a   :  { %v974_v26 = vrot.slane %v967_v25, %v2801_v4  ;;  %v2274_v27 = vpop.f32.mrb[9].mxu0 }
0x114c   :  { %976 = vrot.lane.b32.xlu0 %v974_v26, %s2636_s23 }
0x11be   :  { %v977_v29 = vpop.permute.xlu0 %976 }
0x11bf   :  { %v979_v30 = vadd.f32 %v977_v29, %v2740_v23 }
0x11c1   :  { %2542 = vtanh.f32 %v979_v30 }
0x11cb   :  { %v2543_v31 = vpop.eup %2542 }
0x11cc   :  { %v981_v32 = vmul.f32 %v2543_v31, %v2806_v11 }
0x11ce   :  { %983 = vrot.lane.b32.xlu0 %v981_v32, %s2637_s6 }
0x1240   :  { %v984_v33 = vpop.permute.xlu0 %983 }
0x1241   :  { %v986_v34 = vsel %vm43_vm1, %v984_v33, 0.0 }
0x1242   :  { %987 = vadd.xlane.f32.xlu0 %v986_v34 }
0x12cf   :  { %v988_v35 = vpop.xlane.xlu0 %987 }
0x12d0   :  { %v989_v36 = vrot.slane %v988_v35, 4 }
0x12d2   :  { %v990_v37 = vmax.f32 %v988_v35, %v989_v36 }
0x12d4   :  { %v991_v38 = vrot.slane %v990_v37, 2 }
0x12d6   :  { %v992_v40 = vmax.f32 %v990_v37, %v991_v38 }
0x12d8   :  { %v993_v41 = vrot.slane %v992_v40, 1 }
0x12da   :  { %v994_v42 = vmax.f32 %v992_v40, %v993_v41 }
0x12dc   :  { %v995_v44 = vsub.f32 %v988_v35, %v994_v42 }
0x12de   :  { %v996_v45 = vmul.f32 1.442695, %v995_v44 }
0x12e0   :  { %2544 = vpow2.f32 %v996_v45 }
0x12ea   :  { %v2545_v48 = vpop.eup %2544 }
0x12eb   :  { %v998_v49 = vrot.slane %v2545_v48, 4 }
0x12ed   :  { %v999_v50 = vadd.f32 %v2545_v48, %v998_v49 }
0x12ef   :  { %v1000_v51 = vrot.slane %v999_v50, 2 }
0x12f1   :  { %v1001_v52 = vadd.f32 %v1000_v51, %v999_v50 }
0x12f3   :  { %v1002_v53 = vrot.slane %v1001_v52, 1 }
0x12f5   :  { %v1003_v55 = vadd.f32 %v1002_v53, %v1001_v52 }
0x12f7   :  { %2546 = vrcp.f32 %v1003_v55 }
0x1301   :  { %v2547_v56 = vpop.eup %2546 }
0x1302   :  { %v1005_v57 = vmul.f32 %v2547_v56, %v2545_v48 }
0x1304   :  { %v1006_v58 = vmul.f32 %v1005_v57, %v2740_v23 }
0x1306   :  { %v1007_v59 = vsel %vm428_vm2, %v1006_v58, 0.0 }
0x1307   :  { %v1008_v60 = vrot.slane %v1007_v59, 4 }
0x1309   :  { %v1009_v61 = vadd.f32 %v1008_v60, %v1007_v59 }
0x130b   :  { %v1010_v63 = vrot.slane %v1009_v61, 2 }
0x130d   :  { %v1011_v0 = vadd.f32 %v1010_v63, %v1009_v61 }
0x130f   :  { %v1012_v2 = vrot.slane %v1011_v0, 1 }
0x1311   :  { %v1013_v5 = vadd.f32 %v1012_v2, %v1011_v0 }
0x1313   :  { %1015 = vrot.lane.b32.xlu1 %v1013_v5, %s2637_s6 }
0x1385   :  { %v1016_v6 = vpop.permute.xlu1 %1015 }
0x1386   :  { %2284 = vmatmul.mubr.msk.f32.vlgmr.msra.gmra.mrb[8].mxu1 %vm43_vm1, %v1016_v6 }
0x1387   :  { %2442 = vmatpush3.bf16.msra.mxu1 %v2774_v54  ;;  %2305 = vmatprep.mubr.msk.f32.mxu1 %vm2633_vm0, %v2634_v9 }
0x1388   :  { %2443 = vmatprep.subr.bf16.mxu1 %v2632_v3 }
0x138b   :  { %2445 = vmatpush3.bf16.msra.mxu1 %v2783_v62 }
0x138c   :  { %2452 = vmatprep.subr.bf16.mxu1 %v2632_v3 }
0x1459   :  { %v1085_v7 = vpop.f32.mrb[8].mxu1 }
0x145a   :  { %v1092_v8 = vrot.slane %v1085_v7, %v2801_v4  ;;  %v2285_v10 = vpop.f32.mrb[9].mxu1 }
0x145c   :  { %v1093_v12 = vadd.f32 %v1092_v8, %v2740_v23 }
0x145e   :  { %2548 = vtanh.f32 %v1093_v12 }
0x1468   :  { %v2549_v13 = vpop.eup %2548 }
0x1469   :  { %v1095_v15 = vmul.f32 %v2549_v13, %v2842_v39 }
0x146b   :  { %v1096_v18 = vsel %vm43_vm1, %v1095_v15, 0.0 }
0x146c   :  { %1097 = vadd.xlane.f32.xlu0 %v1096_v18 }
0x14f9   :  { %v1098_v19 = vpop.xlane.xlu0 %1097 }
0x14fa   :  { %v1099_v20 = vrot.slane %v1098_v19, 4 }
0x14fc   :  { %v1100_v22 = vmax.f32 %v1098_v19, %v1099_v20 }
0x14fe   :  { %v1101_v24 = vrot.slane %v1100_v22, 2 }
0x1500   :  { %v1102_v25 = vmax.f32 %v1100_v22, %v1101_v24 }
0x1502   :  { %v1103_v26 = vrot.slane %v1102_v25, 1 }
0x1504   :  { %v1104_v27 = vmax.f32 %v1102_v25, %v1103_v26 }
0x1506   :  { %v1105_v29 = vsub.f32 %v1098_v19, %v1104_v27 }
0x1508   :  { %v1106_v30 = vmul.f32 1.442695, %v1105_v29 }
0x150a   :  { %2550 = vpow2.f32 %v1106_v30 }
0x1514   :  { %v2551_v31 = vpop.eup %2550 }
0x1515   :  { %v1108_v32 = vrot.slane %v2551_v31, 4 }
0x1517   :  { %v1109_v33 = vadd.f32 %v2551_v31, %v1108_v32 }
0x1519   :  { %v1110_v34 = vrot.slane %v1109_v33, 2 }
0x151b   :  { %v1111_v35 = vadd.f32 %v1110_v34, %v1109_v33 }
0x151d   :  { %v1112_v36 = vrot.slane %v1111_v35, 1 }
0x151f   :  { %v1113_v37 = vadd.f32 %v1112_v36, %v1111_v35 }
0x1521   :  { %2552 = vrcp.f32 %v1113_v37 }
0x152b   :  { %v2553_v38 = vpop.eup %2552 }
0x152c   :  { %v1115_v40 = vmul.f32 %v2553_v38, %v2551_v31 }
0x152e   :  { %v1116_v41 = vmul.f32 %v1115_v40, %v2706_v16 }
0x1530   :  { %v1117_v42 = vsel %vm43_vm1, %v1116_v41, 0.0 }
0x1531   :  { %v1118_v44 = vrot.slane %v1117_v42, 4 }
0x1533   :  { %v1119_v45 = vadd.f32 %v1118_v44, %v1117_v42 }
0x1535   :  { %v1120_v48 = vrot.slane %v1119_v45, 2 }
0x1537   :  { %v1121_v49 = vadd.f32 %v1120_v48, %v1119_v45 }
0x1539   :  { %v1122_v50 = vrot.slane %v1121_v49, 1 }
0x153b   :  { %v2909_v51 = vadd.f32 %v1122_v50, %v1121_v49 }
0x153d   :  { %2295 = vmatmul.mubr.msk.f32.vlgmr.msra.gmra.mrb[10].mxu0 %vm43_vm1, %v2909_v51 }
0x153e   :  { %2448 = vmatpush3.bf16.msra.mxu0 %v2774_v54  ;;  %2316 = vmatprep.mubr.msk.f32.mxu0 %vm2633_vm0, %v2634_v9 }
0x153f   :  { %2449 = vmatprep.subr.bf16.mxu0 %v2632_v3 }
0x1542   :  { %2451 = vmatpush3.bf16.msra.mxu0 %v2783_v62 }
0x1543   :  { %2458 = vmatprep.subr.bf16.mxu0 %v2632_v3 }
0x1610   :  { %v1205_v16 = vpop.f32.mrb[10].mxu0 }
0x1611   :  { %v1206_v52 = vadd.f32 %v1205_v16, %v2745_v28  ;;  %v2296_v53 = vpop.f32.mrb[11].mxu0 }
0x1613   :  { %2554 = vtanh.f32 %v1206_v52  ;;  %v2077_v56 = vmul.f32 -1.442695, %v1206_v52 }
0x1615   :  { %2556 = vpow2.f32 %v2077_v56 }
0x161d   :  { %v2555_v55 = vpop.eup %2554 }
0x161e   :  { %1218 = vrot.lane.b32.xlu0 %v2555_v55, %s2635_s20 }
0x161f   :  { %v2557_v57 = vpop.eup %2556 }
0x1620   :  { %v1212_v58 = vadd.f32 1.0, %v2557_v57 }
0x1622   :  { %2558 = vrcp.f32 %v1212_v58 }
0x162c   :  { %v2559_v59 = vpop.eup %2558 }
0x162d   :  { %v1216_v63 = vmul.f32 %v2559_v59, %v2771_v47 }
0x1690   :  { %v1219_v60 = vpop.permute.xlu0 %1218 }
0x1691   :  { %v1221_v61 = vmul.f32 %v2559_v59, %v1219_v60 }
0x1693   :  { %1223 = vrot.lane.b32.xlu1 %v1221_v61, %s2636_s23 }
0x1705   :  { %v1224_v0 = vpop.permute.xlu1 %1223 }
0x1706   :  { %v1226_v2 = vadd.f32 %v1224_v0, %v1216_v63 }
0x1708   :  { %2560 = vtanh.f32 %v1226_v2 }
0x1712   :  { %v2561_v5 = vpop.eup %2560 }
0x1713   :  { %1229 = vrot.lane.b32.xlu1 %v2561_v5, %s2635_s20 }
0x1785   :  { %v1230_v6 = vpop.permute.xlu1 %1229 }
0x1786   :  { %v1232_v7 = vmul.f32 %v2559_v59, %v1230_v6 }
0x1788   :  { %1234 = vrot.lane.b32.xlu1 %v1232_v7, %s2636_s23 }
0x17fa   :  { %v1235_v8 = vpop.permute.xlu1 %1234 }
0x17fb   :  { %2306 = vmatmul.mubr.msk.f32.vlgmr.msra.gmra.mrb[10].mxu1 %vm43_vm1, %v1235_v8 }
0x17fc   :  { %2454 = vmatpush3.bf16.msra.mxu1 %v2760_v43  ;;  %2327 = vmatprep.mubr.msk.f32.mxu1 %vm2633_vm0, %v2634_v9 }
0x17fd   :  { %2455 = vmatprep.subr.bf16.mxu1 %v2632_v3 }
0x1800   :  { %2457 = vmatpush3.bf16.msra.mxu1 %v2768_v46 }
0x1801   :  { %2464 = vmatprep.subr.bf16.mxu1 %v2632_v3 }
0x18ce   :  { %v1304_v10 = vpop.f32.mrb[10].mxu1 }
0x18cf   :  { %v1311_v12 = vrot.slane %v1304_v10, %v2801_v4  ;;  %v2307_v13 = vpop.f32.mrb[11].mxu1 }
0x18d1   :  { %1313 = vrot.lane.b32.xlu1 %v1311_v12, %s2636_s23 }
0x1943   :  { %v1314_v15 = vpop.permute.xlu1 %1313 }
0x1944   :  { %v1316_v18 = vadd.f32 %v1314_v15, %v2740_v23 }
0x1946   :  { %2562 = vtanh.f32 %v1316_v18 }
0x1950   :  { %v2563_v19 = vpop.eup %2562 }
0x1951   :  { %v1318_v20 = vmul.f32 %v2563_v19, %v2806_v11 }
0x1953   :  { %1320 = vrot.lane.b32.xlu1 %v1318_v20, %s2637_s6 }
0x19c5   :  { %v1321_v22 = vpop.permute.xlu1 %1320 }
0x19c6   :  { %v1323_v24 = vsel %vm43_vm1, %v1321_v22, 0.0 }
0x19c7   :  { %1324 = vadd.xlane.f32.xlu0 %v1323_v24 }
0x1a54   :  { %v1325_v25 = vpop.xlane.xlu0 %1324 }
0x1a55   :  { %v1326_v26 = vrot.slane %v1325_v25, 4 }
0x1a57   :  { %v1327_v27 = vmax.f32 %v1325_v25, %v1326_v26 }
0x1a59   :  { %v1328_v29 = vrot.slane %v1327_v27, 2 }
0x1a5b   :  { %v1329_v30 = vmax.f32 %v1327_v27, %v1328_v29 }
0x1a5d   :  { %v1330_v31 = vrot.slane %v1329_v30, 1 }
0x1a5f   :  { %v1331_v32 = vmax.f32 %v1329_v30, %v1330_v31 }
0x1a61   :  { %v1332_v33 = vsub.f32 %v1325_v25, %v1331_v32 }
0x1a63   :  { %v1333_v34 = vmul.f32 1.442695, %v1332_v33 }
0x1a65   :  { %2564 = vpow2.f32 %v1333_v34 }
0x1a6f   :  { %v2565_v35 = vpop.eup %2564 }
0x1a70   :  { %v1335_v36 = vrot.slane %v2565_v35, 4 }
0x1a72   :  { %v1336_v37 = vadd.f32 %v2565_v35, %v1335_v36 }
0x1a74   :  { %v1337_v38 = vrot.slane %v1336_v37, 2 }
0x1a76   :  { %v1338_v40 = vadd.f32 %v1337_v38, %v1336_v37 }
0x1a78   :  { %v1339_v41 = vrot.slane %v1338_v40, 1 }
0x1a7a   :  { %v1340_v42 = vadd.f32 %v1339_v41, %v1338_v40 }
0x1a7c   :  { %2566 = vrcp.f32 %v1340_v42 }
0x1a86   :  { %v2567_v44 = vpop.eup %2566 }
0x1a87   :  { %v1342_v45 = vmul.f32 %v2567_v44, %v2565_v35 }
0x1a89   :  { %v1343_v48 = vmul.f32 %v1342_v45, %v2740_v23 }
0x1a8b   :  { %v1344_v49 = vsel %vm428_vm2, %v1343_v48, 0.0 }
0x1a8c   :  { %v1345_v50 = vrot.slane %v1344_v49, 4 }
0x1a8e   :  { %v1346_v16 = vadd.f32 %v1345_v50, %v1344_v49 }
0x1a90   :  { %v1347_v52 = vrot.slane %v1346_v16, 2 }
0x1a92   :  { %v1348_v53 = vadd.f32 %v1347_v52, %v1346_v16 }
0x1a94   :  { %v1349_v55 = vrot.slane %v1348_v53, 1 }
0x1a96   :  { %v1350_v56 = vadd.f32 %v1349_v55, %v1348_v53 }
0x1a98   :  { %1352 = vrot.lane.b32.xlu1 %v1350_v56, %s2637_s6 }
0x1b0a   :  { %v1353_v57 = vpop.permute.xlu1 %1352 }
0x1b0b   :  { %2317 = vmatmul.mubr.msk.f32.vlgmr.msra.gmra.mrb[12].mxu0 %vm43_vm1, %v1353_v57 }
0x1b0c   :  { %2460 = vmatpush3.bf16.msra.mxu0 %v2708_v17  ;;  %2338 = vmatprep.mubr.msk.f32.mxu0 %vm2633_vm0, %v2634_v9 }
0x1b0d   :  { %2461 = vmatprep.subr.bf16.mxu0 %v2632_v3 }
0x1b10   :  { %2463 = vmatpush3.bf16.msra.mxu0 %v2725_v21 }
0x1b11   :  { %2470 = vmatprep.subr.bf16.mxu0 %v2632_v3 }
0x1bde   :  { %v1422_v58 = vpop.f32.mrb[12].mxu0 }
0x1bdf   :  { %v1429_v59 = vrot.slane %v1422_v58, %v2801_v4  ;;  %v2318_v60 = vpop.f32.mrb[13].mxu0 }
0x1be1   :  { %1431 = vrot.lane.b32.xlu1 %v1429_v59, %s2636_s23 }
0x1c53   :  { %v1432_v61 = vpop.permute.xlu1 %1431 }
0x1c54   :  { %v1434_v63 = vadd.f32 %v1432_v61, %v2740_v23 }
0x1c56   :  { %2568 = vtanh.f32 %v1434_v63 }
0x1c60   :  { %v2569_v17 = vpop.eup %2568 }
0x1c61   :  { %v1436_v0 = vmul.f32 %v2569_v17, %v2806_v11 }
0x1c63   :  { %1438 = vrot.lane.b32.xlu1 %v1436_v0, %s2637_s6 }
0x1cd5   :  { %v1439_v2 = vpop.permute.xlu1 %1438 }
0x1cd6   :  { %v1441_v21 = vsel %vm43_vm1, %v1439_v2, 0.0 }
0x1cd7   :  { %1442 = vadd.xlane.f32.xlu1 %v1441_v21 }
0x1d64   :  { %v1443_v5 = vpop.xlane.xlu1 %1442 }
0x1d65   :  { %v1444_v6 = vrot.slane %v1443_v5, 4 }
0x1d67   :  { %v1445_v7 = vmax.f32 %v1443_v5, %v1444_v6 }
0x1d69   :  { %v1446_v8 = vrot.slane %v1445_v7, 2 }
0x1d6b   :  { %v1447_v10 = vmax.f32 %v1445_v7, %v1446_v8  ;;  %v2971_v7 = vld [vmem:[%s3050_s0] sm:$0xff] }
0x1d6d   :  { %v1448_v12 = vrot.slane %v1447_v10, 1 }
0x1d6f   :  { %v1449_v13 = vmax.f32 %v1447_v10, %v1448_v12 }
0x1d71   :  { %v1450_v15 = vsub.f32 %v1443_v5, %v1449_v13 }
0x1d73   :  { %v1451_v18 = vmul.f32 1.442695, %v1450_v15 }
0x1d75   :  { %2570 = vpow2.f32 %v1451_v18 }
0x1d7f   :  { %v2571_v19 = vpop.eup %2570 }
0x1d80   :  { %v1453_v20 = vrot.slane %v2571_v19, 4 }
0x1d82   :  { %v1454_v22 = vadd.f32 %v2571_v19, %v1453_v20 }
0x1d84   :  { %v1455_v24 = vrot.slane %v1454_v22, 2 }
0x1d86   :  { %v1456_v25 = vadd.f32 %v1455_v24, %v1454_v22 }
0x1d88   :  { %v1457_v26 = vrot.slane %v1456_v25, 1 }
0x1d8a   :  { %v1458_v27 = vadd.f32 %v1457_v26, %v1456_v25 }
0x1d8c   :  { %2572 = vrcp.f32 %v1458_v27 }
0x1d96   :  { %v2573_v29 = vpop.eup %2572 }
0x1d97   :  { %v1460_v30 = vmul.f32 %v2573_v29, %v2571_v19 }
0x1d99   :  { %v1461_v31 = vmul.f32 %v1460_v30, %v2740_v23 }
0x1d9b   :  { %v1462_v32 = vsel %vm428_vm2, %v1461_v31, 0.0 }
0x1d9c   :  { %v1463_v33 = vrot.slane %v1462_v32, 4 }
0x1d9e   :  { %v1464_v34 = vadd.f32 %v1463_v33, %v1462_v32 }
0x1da0   :  { %v1465_v35 = vrot.slane %v1464_v34, 2 }
0x1da2   :  { %v1466_v36 = vadd.f32 %v1465_v35, %v1464_v34 }
0x1da4   :  { %v1467_v37 = vrot.slane %v1466_v36, 1 }
0x1da6   :  { %v1468_v38 = vadd.f32 %v1467_v37, %v1466_v36 }
0x1da8   :  { %1470 = vrot.lane.b32.xlu0 %v1468_v38, %s2637_s6 }
0x1e1a   :  { %v1471_v40 = vpop.permute.xlu0 %1470 }
0x1e1b   :  { %2328 = vmatmul.mubr.msk.f32.vlgmr.msra.gmra.mrb[12].mxu1 %vm43_vm1, %v1471_v40 }
0x1e1c   :  { %2466 = vmatpush3.bf16.msra.mxu1 %v2774_v54  ;;  %2349 = vmatprep.mubr.msk.f32.mxu1 %vm2633_vm0, %v2634_v9 }
0x1e1d   :  { %2467 = vmatprep.subr.bf16.mxu1 %v2632_v3 }
0x1e20   :  { %2469 = vmatpush3.bf16.msra.mxu1 %v2783_v62 }
0x1e21   :  { %2476 = vmatprep.subr.bf16.mxu1 %v2632_v3 }
0x1eee   :  { %v1540_v41 = vpop.f32.mrb[12].mxu1 }
0x1eef   :  { %v1547_v42 = vrot.slane %v1540_v41, %v2801_v4  ;;  %v2329_v44 = vpop.f32.mrb[13].mxu1 }
0x1ef1   :  { %v1548_v45 = vadd.f32 %v1547_v42, %v2740_v23 }
0x1ef3   :  { %2574 = vtanh.f32 %v1548_v45 }
0x1efd   :  { %v2575_v48 = vpop.eup %2574 }
0x1efe   :  { %v1550_v49 = vmul.f32 %v2575_v48, %v2842_v39 }
0x1f00   :  { %v1551_v50 = vsel %vm43_vm1, %v1550_v49, 0.0 }
0x1f01   :  { %1552 = vadd.xlane.f32.xlu1 %v1551_v50 }
0x1f8e   :  { %v1553_v16 = vpop.xlane.xlu1 %1552 }
0x1f8f   :  { %v1554_v52 = vrot.slane %v1553_v16, 4 }
0x1f91   :  { %v1555_v53 = vmax.f32 %v1553_v16, %v1554_v52 }
0x1f93   :  { %v1556_v55 = vrot.slane %v1555_v53, 2 }
0x1f95   :  { %v1557_v56 = vmax.f32 %v1555_v53, %v1556_v55 }
0x1f97   :  { %v1558_v57 = vrot.slane %v1557_v56, 1 }
0x1f99   :  { %v1559_v58 = vmax.f32 %v1557_v56, %v1558_v57 }
0x1f9b   :  { %v1560_v59 = vsub.f32 %v1553_v16, %v1559_v58 }
0x1f9d   :  { %v1561_v60 = vmul.f32 1.442695, %v1560_v59 }
0x1f9f   :  { %2576 = vpow2.f32 %v1561_v60 }
0x1fa9   :  { %v2577_v61 = vpop.eup %2576 }
0x1faa   :  { %v1563_v63 = vrot.slane %v2577_v61, 4 }
0x1fac   :  { %v1564_v17 = vadd.f32 %v2577_v61, %v1563_v63 }
0x1fae   :  { %v1565_v0 = vrot.slane %v1564_v17, 2 }
0x1fb0   :  { %v1566_v2 = vadd.f32 %v1565_v0, %v1564_v17 }
0x1fb2   :  { %v1567_v21 = vrot.slane %v1566_v2, 1 }
0x1fb4   :  { %v1568_v39 = vadd.f32 %v1567_v21, %v1566_v2 }
0x1fb6   :  { %2578 = vrcp.f32 %v1568_v39 }
0x1fc0   :  { %v2579_v5 = vpop.eup %2578 }
0x1fc1   :  { %v1570_v6 = vmul.f32 %v2579_v5, %v2577_v61 }
0x1fc3   :  { %v1571_v8 = vmul.f32 %v2971_v7, %v1570_v6 }
0x1fc5   :  { %v1572_v10 = vsel %vm43_vm1, %v1571_v8, 0.0 }
0x1fc6   :  { %v1573_v12 = vrot.slane %v1572_v10, 4 }
0x1fc8   :  { %v1574_v13 = vadd.f32 %v1573_v12, %v1572_v10 }
0x1fca   :  { %v1575_v15 = vrot.slane %v1574_v13, 2 }
0x1fcc   :  { %v1576_v18 = vadd.f32 %v1575_v15, %v1574_v13 }
0x1fce   :  { %v1577_v19 = vrot.slane %v1576_v18, 1 }
0x1fd0   :  { %v2975_v20 = vadd.f32 %v1577_v19, %v1576_v18 }
0x1fd2   :  { %2339 = vmatmul.mubr.msk.f32.vlgmr.msra.gmra.mrb[14].mxu0 %vm43_vm1, %v2975_v20 }
0x1fd3   :  { %2472 = vmatpush3.bf16.msra.mxu0 %v2774_v54  ;;  %2360 = vmatprep.mubr.msk.f32.mxu0 %vm2633_vm0, %v2634_v9 }
0x1fd4   :  { %2473 = vmatprep.subr.bf16.mxu0 %v2632_v3 }
0x1fd7   :  { %2475 = vmatpush3.bf16.msra.mxu0 %v2783_v62 }
0x20a5   :  { %v1660_v22 = vpop.f32.mrb[14].mxu0 }
0x20a6   :  { %v1661_v24 = vadd.f32 %v1660_v22, %v2745_v28  ;;  %v2340_v25 = vpop.f32.mrb[15].mxu0 }
0x20a8   :  { %2580 = vtanh.f32 %v1661_v24  ;;  %v2082_v27 = vmul.f32 -1.442695, %v1661_v24 }
0x20aa   :  { %2582 = vpow2.f32 %v2082_v27 }
0x20b2   :  { %v2581_v26 = vpop.eup %2580 }
0x20b3   :  { %1673 = vrot.lane.b32.xlu1 %v2581_v26, %s2635_s20 }
0x20b4   :  { %v2583_v29 = vpop.eup %2582 }
0x20b5   :  { %v1667_v30 = vadd.f32 1.0, %v2583_v29 }
0x20b7   :  { %2584 = vrcp.f32 %v1667_v30 }
0x20c1   :  { %v2585_v54 = vpop.eup %2584 }
0x20c2   :  { %v1671_v62 = vmul.f32 %v2585_v54, %v2771_v47 }
0x2125   :  { %v1674_v31 = vpop.permute.xlu1 %1673 }
0x2126   :  { %v1676_v32 = vmul.f32 %v2585_v54, %v1674_v31 }
0x2128   :  { %1678 = vrot.lane.b32.xlu0 %v1676_v32, %s2636_s23 }
0x219a   :  { %v1679_v33 = vpop.permute.xlu0 %1678 }
0x219b   :  { %v1681_v34 = vadd.f32 %v1679_v33, %v1671_v62 }
0x219d   :  { %2586 = vtanh.f32 %v1681_v34 }
0x21a7   :  { %v2587_v28 = vpop.eup %2586 }
0x21a8   :  { %1684 = vrot.lane.b32.xlu0 %v2587_v28, %s2635_s20 }
0x221a   :  { %v1685_v35 = vpop.permute.xlu0 %1684 }
0x221b   :  { %v1687_v36 = vmul.f32 %v2585_v54, %v1685_v35 }
0x221d   :  { %1689 = vrot.lane.b32.xlu0 %v1687_v36, %s2636_s23 }
0x228f   :  { %v1690_v37 = vpop.permute.xlu0 %1689 }
0x2290   :  { %2350 = vmatmul.mubr.msk.f32.vlgmr.msra.gmra.mrb[14].mxu1 %vm43_vm1, %v1690_v37 }
0x2291   :  { %2478 = vmatpush3.bf16.msra.mxu1 %v2760_v43  ;;  %2371 = vmatprep.mubr.msk.f32.mxu1 %vm2633_vm0, %v2634_v9 }
0x2292   :  { %2479 = vmatprep.subr.bf16.mxu1 %v2632_v3 }
0x2295   :  { %2481 = vmatpush3.bf16.msra.mxu1 %v2768_v46 }
0x2363   :  { %v1759_v47 = vpop.f32.mrb[14].mxu1 }
0x2364   :  { %v1766_v38 = vrot.slane %v1759_v47, %v2801_v4  ;;  %v2351_v40 = vpop.f32.mrb[15].mxu1 }
0x2366   :  { %1768 = vrot.lane.b32.xlu0 %v1766_v38, %s2636_s23 }
0x23d8   :  { %v1769_v41 = vpop.permute.xlu0 %1768 }
0x23d9   :  { %v1771_v42 = vadd.f32 %v1769_v41, %v2740_v23 }
0x23db   :  { %2588 = vtanh.f32 %v1771_v42 }
0x23e5   :  { %v2589_v44 = vpop.eup %2588 }
0x23e6   :  { %v1773_v43 = vmul.f32 %v2589_v44, %v2806_v11 }
0x23e8   :  { %1775 = vrot.lane.b32.xlu0 %v1773_v43, %s2637_s6 }
0x245a   :  { %v1776_v9 = vpop.permute.xlu0 %1775 }
0x245b   :  { %v1778_v3 = vsel %vm43_vm1, %v1776_v9, 0.0 }
0x245c   :  { %1779 = vadd.xlane.f32.xlu1 %v1778_v3 }
0x24e9   :  { %v1780_v46 = vpop.xlane.xlu1 %1779 }
0x24ea   :  { %v1781_v45 = vrot.slane %v1780_v46, 4 }
0x24ec   :  { %v1782_v48 = vmax.f32 %v1780_v46, %v1781_v45 }
0x24ee   :  { %v1783_v49 = vrot.slane %v1782_v48, 2 }
0x24f0   :  { %v1784_v50 = vmax.f32 %v1782_v48, %v1783_v49 }
0x24f2   :  { %v1785_v16 = vrot.slane %v1784_v50, 1 }
0x24f4   :  { %v1786_v52 = vmax.f32 %v1784_v50, %v1785_v16  ;;  %v41_v16 = vld [vmem:[%s3053_s3 + $0x6] sm:$0x1] }
0x24f6   :  { %v1787_v53 = vsub.f32 %v1780_v46, %v1786_v52  ;;  %v1124_v52 = vmul.f32 %v2909_v51, %v41_v16 }
0x24f8   :  { %v1788_v55 = vmul.f32 1.442695, %v1787_v53  ;;  %v1125_v53 = vsel %vm669_vm3, %v1124_v52, 0.0 }
0x24fa   :  { %2590 = vpow2.f32 %v1788_v55  ;;  %v2638_v55 = vmov 0  }
0x24fb   :  { %2501 = vset.pattern.permute.xlu1 %v2638_v55  ;;  %2500 = vset.pattern.permute.xlu0 %v2638_v55 }
0x2504   :  { %v2591_v56 = vpop.eup %2590 }
0x2505   :  { %v1790_v57 = vrot.slane %v2591_v56, 4 }
0x2507   :  { %v1791_v58 = vadd.f32 %v2591_v56, %v1790_v57  ;;  %v42_v57 = vld [vmem:[%s3053_s3 + $0x7] sm:$0x1] }
0x2509   :  { %v1792_v59 = vrot.slane %v1791_v58, 2 }
0x250b   :  { %v1793_v60 = vadd.f32 %v1792_v59, %v1791_v58 }
0x250d   :  { %v1794_v61 = vrot.slane %v1793_v60, 1 }
0x250f   :  { %v1795_v63 = vadd.f32 %v1794_v61, %v1793_v60 }
0x2511   :  { %2592 = vrcp.f32 %v1795_v63 }
0x251b   :  { %v2593_v17 = vpop.eup %2592 }
0x251c   :  { %v1797_v0 = vmul.f32 %v2593_v17, %v2591_v56 }
0x251e   :  { %v1798_v2 = vmul.f32 %v1797_v0, %v2740_v23  ;;  %v2607_v0 = vld [vmem:[%s3053_s3 + $0x4] ss:$0 sm:$0xff]  ;;  %s2639_s3 = smov [#allocation2]  }
0x251f   :  { %s2054_s1 = sshll.u32 %s2639_s3, 4  ;;  %s2055_s1 = int_to_ptr.vmem [resolvable:$true] %s2054_s1 }
0x2520   :  { %v1799_v21 = vsel %vm428_vm2, %v1798_v2, 0.0  ;;  %s2608_s17 = scalar_lea.vmem %s2055_s1, 16  ;;  %s2612_s18 = scalar_lea.vmem %s2055_s1, 32 }
0x2521   :  { %v1800_v39 = vrot.slane %v1799_v21, 4  ;;  %p2609_p0 = scmp.ne.s32.totalorder %s2055_s1, %s2608_s17  ;;  %p2613_p1 = scmp.lt.s32.totalorder %s2055_s1, %s2055_s1 }
0x2522   :  { %p2614_p2 = scmp.lt.s32.totalorder %s2612_s18, %s2608_s17 }
0x2523   :  { %v1801_v5 = vadd.f32 %v1800_v39, %v1799_v21  ;;  %v668_v39 = vmul.f32 %v2848_v14, %v41_v16 }
0x2524   :  { %p2615_p3 = por %p2614_p2, %p2613_p1 }
0x2525   :  { %v1802_v6 = vrot.slane %v1801_v5, 2 }
0x2526   :  { %p2616_p4 = pnand %p2615_p3, %p2609_p0 }
0x2527   :  { %v1803_v8 = vadd.f32 %v1802_v6, %v1801_v5  ;;  %v670_v5 = vsel %vm669_vm3, %v668_v39, 0.0  ;;  %v1579_v6 = vmul.f32 %v2975_v20, %v41_v16 }
0x2529   :  { %v1804_v10 = vrot.slane %v1803_v8, 1 }
0x252b   :  { %v1805_v12 = vadd.f32 %v1804_v10, %v1803_v8 }
0x252d   :  { %1807 = vrot.lane.b32.xlu0 %v1805_v12, %s2637_s6 }
0x259f   :  { %v1808_v13 = vpop.permute.xlu0 %1807 }
0x25a0   :  { %2361 = vmatmul.mubr.msk.f32.vlgmr.msra.gmra.mrb[16].mxu0 %vm43_vm1, %v1808_v13 }
0x2673   :  { %v1877_v15 = vpop.f32.mrb[16].mxu0 }
0x2674   :  { %v1884_v18 = vrot.slane %v1877_v15, %v2801_v4  ;;  %v2362_v19 = vpop.f32.mrb[17].mxu0 }
0x2676   :  { %1886 = vrot.lane.b32.xlu0 %v1884_v18, %s2636_s23 }
0x26e8   :  { %v1887_v22 = vpop.permute.xlu0 %1886 }
0x26e9   :  { %v1889_v24 = vadd.f32 %v1887_v22, %v2740_v23 }
0x26eb   :  { %2594 = vtanh.f32 %v1889_v24 }
0x26f5   :  { %v2595_v25 = vpop.eup %2594 }
0x26f6   :  { %v1891_v26 = vmul.f32 %v2595_v25, %v2806_v11 }
0x26f8   :  { %1893 = vrot.lane.b32.xlu0 %v1891_v26, %s2637_s6 }
0x276a   :  { %v1894_v27 = vpop.permute.xlu0 %1893 }
0x276b   :  { %v1896_v29 = vsel %vm43_vm1, %v1894_v27, 0.0 }
0x276c   :  { %1897 = vadd.xlane.f32.xlu0 %v1896_v29 }
0x27f9   :  { %v1898_v30 = vpop.xlane.xlu0 %1897 }
0x27fa   :  { %v1899_v54 = vrot.slane %v1898_v30, 4 }
0x27fc   :  { %v1900_v31 = vmax.f32 %v1898_v30, %v1899_v54 }
0x27fe   :  { %v1901_v32 = vrot.slane %v1900_v31, 2 }
0x2800   :  { %v1902_v62 = vmax.f32 %v1900_v31, %v1901_v32 }
0x2802   :  { %v1903_v33 = vrot.slane %v1902_v62, 1 }
0x2804   :  { %v1904_v34 = vmax.f32 %v1902_v62, %v1903_v33 }
0x2806   :  { %v1905_v28 = vsub.f32 %v1898_v30, %v1904_v34 }
0x2808   :  { %v1906_v35 = vmul.f32 1.442695, %v1905_v28 }
0x280a   :  { %2596 = vpow2.f32 %v1906_v35 }
0x2814   :  { %v2597_v36 = vpop.eup %2596 }
0x2815   :  { %v1908_v37 = vrot.slane %v2597_v36, 4 }
0x2817   :  { %v1909_v47 = vadd.f32 %v2597_v36, %v1908_v37 }
0x2819   :  { %v1910_v11 = vrot.slane %v1909_v47, 2 }
0x281b   :  { %v1911_v38 = vadd.f32 %v1910_v11, %v1909_v47 }
0x281d   :  { %v1912_v40 = vrot.slane %v1911_v38, 1 }
0x281f   :  { %v1913_v41 = vadd.f32 %v1912_v40, %v1911_v38 }
0x2821   :  { %2598 = vrcp.f32 %v1913_v41 }
0x282b   :  { %v2599_v42 = vpop.eup %2598 }
0x282c   :  { %v1915_v44 = vmul.f32 %v2599_v42, %v2597_v36 }
0x282e   :  { %v1916_v43 = vmul.f32 %v1915_v44, %v2740_v23 }
0x2830   :  { %v1917_v9 = vsel %vm428_vm2, %v1916_v43, 0.0  ;;  %v191_v43 = vand.u32 127, %v190_v1 }
0x2831   :  { %v1918_v3 = vrot.slane %v1917_v9, 4 }
0x2832   :  { %vm674_vm4 = vcmp.eq.s32.totalorder %v191_v43, 0  ;;  %vm1129_vm5 = vcmp.eq.s32.totalorder %v191_v43, 1  ;;  %vm1584_vm6 = vcmp.eq.s32.totalorder %v191_v43, 2  ;;  %vm2039_vm7 = vcmp.eq.s32.totalorder %v191_v43, 3 }
0x2833   :  { %v1919_v46 = vadd.f32 %v1918_v3, %v1917_v9 }
0x2835   :  { %v1920_v45 = vrot.slane %v1919_v46, 2 }
0x2837   :  { %v1921_v48 = vadd.f32 %v1920_v45, %v1919_v46 }
0x2839   :  { %v1922_v49 = vrot.slane %v1921_v48, 1 }
0x283b   :  { %v1923_v50 = vadd.f32 %v1922_v49, %v1921_v48 }
0x283d   :  { %1925 = vrot.lane.b32.xlu1 %v1923_v50, %s2637_s6 }
0x2861   :  { %1126 = vadd.xlane.f32.xlu1 %v1125_v53 }
0x28af   :  { %v1926_v56 = vpop.permute.xlu1 %1925 }
0x28b0   :  { %2372 = vmatmul.mubr.msk.f32.vlgmr.msra.gmra.mrb[16].mxu1 %vm43_vm1, %v1926_v56 }
0x28ee   :  { %v1127_v58 = vpop.xlane.xlu1 %1126 }
0x28ef   :  { %v1128_v59 = vadd.f32 %v1127_v58, %v42_v57 }
0x28f1   :  { %1132 = vperm.xlu1 %2501, %v1128_v59  }
0x2970   :  { %v1133_v3 = vpop.permute.xlu1 %1132 }
0x2983   :  { %v1995_v60 = vpop.f32.mrb[16].mxu1 }
0x2984   :  { %v2002_v51 = vrot.slane %v1995_v60, %v2801_v4  ;;  %v2373_v61 = vpop.f32.mrb[17].mxu1  ;;  %v1580_v4 = vsel %vm669_vm3, %v1579_v6, 0.0 }
0x2986   :  { %v2003_v63 = vadd.f32 %v2002_v51, %v2740_v23 }
0x2988   :  { %2600 = vtanh.f32 %v2003_v63 }
0x2992   :  { %v2601_v17 = vpop.eup %2600 }
0x2993   :  { %v2005_v2 = vmul.f32 %v2607_v0, %v2601_v17 }
0x2995   :  { %v2006_v21 = vsel %vm43_vm1, %v2005_v2, 0.0 }
0x2996   :  { %2007 = vadd.xlane.f32.xlu0 %v2006_v21 }
0x299a   :  { %671 = vadd.xlane.f32.xlu0 %v670_v5 }
0x299e   :  { %1581 = vadd.xlane.f32.xlu0 %v1580_v4 }
0x2a23   :  { %v2008_v23 = vpop.xlane.xlu0 %2007 }
0x2a24   :  { %v2009_v8 = vrot.slane %v2008_v23, 4 }
0x2a26   :  { %v2010_v10 = vmax.f32 %v2008_v23, %v2009_v8 }
0x2a27   :  { %v672_v12 = vpop.xlane.xlu0 %671 }
0x2a28   :  { %v2011_v13 = vrot.slane %v2010_v10, 2  ;;  %v673_v41 = vadd.f32 %v672_v12, %v42_v57 }
0x2a2a   :  { %v2012_v15 = vmax.f32 %v2010_v10, %v2011_v13 }
0x2a2b   :  { %v1582_v18 = vpop.xlane.xlu0 %1581 }
0x2a2c   :  { %v2013_v19 = vrot.slane %v2012_v15, 1  ;;  %v1583_v22 = vadd.f32 %v1582_v18, %v42_v57 }
0x2a2e   :  { %v2014_v24 = vmax.f32 %v2012_v15, %v2013_v19  ;;  %1587 = vperm.xlu1 %2501, %v1583_v22  }
0x2a30   :  { %v2015_v14 = vsub.f32 %v2008_v23, %v2014_v24 }
0x2a32   :  { %v2016_v25 = vmul.f32 1.442695, %v2015_v14 }
0x2a34   :  { %2602 = vpow2.f32 %v2016_v25 }
0x2a3e   :  { %v2603_v26 = vpop.eup %2602 }
0x2a3f   :  { %v2018_v20 = vrot.slane %v2603_v26, 4 }
0x2a41   :  { %v2019_v27 = vadd.f32 %v2603_v26, %v2018_v20 }
0x2a43   :  { %v2020_v29 = vrot.slane %v2019_v27, 2 }
0x2a45   :  { %v2021_v30 = vadd.f32 %v2020_v29, %v2019_v27 }
0x2a47   :  { %v2022_v54 = vrot.slane %v2021_v30, 1 }
0x2a49   :  { %v2023_v31 = vadd.f32 %v2022_v54, %v2021_v30 }
0x2a4b   :  { %2604 = vrcp.f32 %v2023_v31 }
0x2a55   :  { %v2605_v32 = vpop.eup %2604 }
0x2a56   :  { %v2025_v62 = vmul.f32 %v2605_v32, %v2603_v26 }
0x2a58   :  { %v2026_v33 = vmul.f32 %v2971_v7, %v2025_v62 }
0x2a5a   :  { %v2027_v34 = vsel %vm43_vm1, %v2026_v33, 0.0 }
0x2a5b   :  { %v2028_v28 = vrot.slane %v2027_v34, 4 }
0x2a5d   :  { %v2029_v35 = vadd.f32 %v2028_v28, %v2027_v34 }
0x2a5f   :  { %v2030_v36 = vrot.slane %v2029_v35, 2 }
0x2a61   :  { %v2031_v37 = vadd.f32 %v2030_v36, %v2029_v35 }
0x2a63   :  { %v2032_v47 = vrot.slane %v2031_v37, 1 }
0x2a65   :  { %v2033_v11 = vadd.f32 %v2032_v47, %v2031_v37 }
0x2a67   :  { %v2034_v38 = vmul.f32 %v2033_v11, %v41_v16 }
0x2a69   :  { %v2035_v40 = vsel %vm669_vm3, %v2034_v38, 0.0 }
0x2a6a   :  { %2036 = vadd.xlane.f32.xlu0 %v2035_v40 }
0x2a80   :  { %677 = vperm.xlu0 %2500, %v673_v41  }
0x2aad   :  { %v1588_v45 = vpop.permute.xlu1 %1587 }
0x2af7   :  { %v2037_v42 = vpop.xlane.xlu0 %2036 }
0x2af8   :  { %v2038_v44 = vadd.f32 %v2037_v42, %v42_v57 }
0x2afa   :  { %2042 = vperm.xlu0 %2500, %v2038_v44  }
0x2aff   :  { %v678_v7 = vpop.permute.xlu0 %677 }
0x2b00   :  { %v680_v9 = vsel %vm674_vm4, %v678_v7, 0.0 }
0x2b01   :  { %v1135_v46 = vsel %vm1129_vm5, %v1133_v3, %v680_v9 }
0x2b02   :  { %v1590_v49 = vsel %vm1584_vm6, %v1588_v45, %v1135_v46 }
0x2b79   :  { %v2043_v48 = vpop.permute.xlu0 %2042 }
0x2b7a   :  { %v2045_v50 = vsel %vm2039_vm7, %v2043_v48, %v1590_v49 }
0x2b7b   :  { %2047 = vst.msk [vmem:[#allocation2] sm:$0x1] %vm2046_vm8, %v2045_v50 }
0x2b7c   :  { %2619 = shalt.err (!%p2616_p4)
}
0x2b7d   :  { %s2620_s21 = scalar_lea.hbm %s3054_s4, 16 }
0x2b7e   :  { %p2621_p5 = scmp.ne.s32.totalorder %s3054_s4, %s2620_s21  ;;  %p2624_p6 = scmp.lt.u32.totalorder %s2620_s21, %s3054_s4 }
0x2b80   :  { %p2626_p7 = pnand %p2624_p6, %p2621_p5 }
0x2b82   :  { %2629 = shalt.err (!%p2626_p7)
}
0x2b83   :  { %2057 = dma.vmem_to_hbm [thread:$0]  %s2055_s1, 16, %s3054_s4, [#allocation3]  }
0x2b84   :  { %2630 = dma.done.wait [#allocation3], 16  }
0x2b85   :  { %2631 = vsyncadd [#allocation3], 4294967280 }
0x2b86   :  { %2061 = vsyncpa [#allocation3], 1 }

</bundles_post_ra>
